<compile_context>
chip_gen: v7x
topology: tpu7x:2x2x1
jax: 0.10.0
libtpu: 0.0.40
codegen_flags: <defaults>
</compile_context>

<pallas_src>
import functools

import jax
import jax.numpy as jnp
from jax import lax
from jax.experimental import pallas as pl
from jax.experimental.pallas import tpu as pltpu


VMEM_LIMIT = 32 * 1024 * 1024   # scoped-VMEM cap (safe headroom on v5e/v6e/v7x)
VMEM_BUDGET = 20 * 1024 * 1024  # target live bytes used by the tile picker


# ----------------------------------------------------------------------------
# Helpers
# ----------------------------------------------------------------------------
def fold_bn(w, b, gamma, beta, mean, var, eps=1e-5):
    """Fold an eval-mode BatchNorm into a (K, N) weight and (N,) bias."""
    s = gamma * jax.lax.rsqrt(var + eps)
    return w * s[None, :], (b - mean) * s + beta


def _round_up(n, m):
    return ((n + m - 1) // m) * m


def _pick_tile(S, dim, a0, p3):
    """Spatial tile size: as big as possible (<=2048) under a rough VMEM budget,
    multiple of 16 for bf16 sublane packing."""
    lane_p3 = max(_round_up(p3, 128), 128)          # xp tile is lane-padded
    per_row = (2 * 2 * lane_p3 * 2                   # xp (2 streams, dbuf) bf16
               + 2 * dim * (4 + 2)                   # a1,a2 f32 + bf16 casts
               + 2 * a0 * 4                          # h1,h2 f32
               + 2 * a0 * 2                          # hcat bf16
               + a0 * 4)                             # f f32
    ts = max(16, min(2048, VMEM_BUDGET // max(per_row, 1)))
    ts = max(16, (ts // 16) * 16)
    return min(ts, _round_up(S, 16))


def _im2col_sel(x_ncdhw, patch):
    """im2col for Conv3d(1, C, kernel=patch, stride=patch), restricted to the
    patch positions a subsequent kernel-1 / stride-2 conv keeps (even indices).

    Returns (B, S, patch**3) rows ordered (B, d', h', w') and S.
    """
    B, C, D, H, W = x_ncdhw.shape
    assert C == 1, "PRTNet streams are single-channel"
    nd, nh, nw = D // patch, H // patch, W // patch
    x = x_ncdhw[:, 0, :nd * patch, :nh * patch, :nw * patch]   # conv drops tail
    x = x.reshape(B, nd, patch, nh, patch, nw, patch)
    x = x[:, ::2, :, ::2, :, ::2, :]                 # stride-2-kept voxels only
    sd, sh, sw = x.shape[1], x.shape[3], x.shape[5]
    x = x.transpose(0, 1, 3, 5, 2, 4, 6)             # (B, sd, sh, sw, p, p, p)
    return x.reshape(B, sd * sh * sw, patch ** 3), sd * sh * sw


# ----------------------------------------------------------------------------
# Fused kernel:
#   con1/con2 (patch conv + BN + ReLU)  -> [ConvMix identity]
#   conv11/conv22 (1x1x1 + BN + ReLU; stride-2 handled by host voxel selection)
#   -> [SAEM/SEEM identity] -> FusionLayer (K=2*a0 dot + BN + ReLU)
#   -> AdaptiveAvgPool3d((1,1,1)) + Flatten -> Linear
# ----------------------------------------------------------------------------
def _prtnet_kernel(xp_ref, pew_ref, peb_ref, cw_ref, cb_ref, wf_ref, bf_ref,
                   lw_ref, lb_ref, feat_ref, logits_ref, acc_ref,
                   *, ts, s_valid, inv_s, masked):
    t = pl.program_id(1)

    @pl.when(t == 0)
    def _():
        acc_ref[...] = jnp.zeros_like(acc_ref)

    # --- con1/con2: patch-embed matmul + folded BN + ReLU (stays in VMEM) ---
    x1 = xp_ref[0, 0]                                 # (ts, p3) bf16
    x2 = xp_ref[1, 0]
    a1 = jnp.maximum(
        jnp.dot(x1, pew_ref[0], preferred_element_type=jnp.float32) + peb_ref[0], 0.0)
    a2 = jnp.maximum(
        jnp.dot(x2, pew_ref[1], preferred_element_type=jnp.float32) + peb_ref[1], 0.0)
    # TODO(synk): ConvMix1/ConvMix2 definitions are not provided in the reference
    # snippet; treated as identity (which is what makes embedding only the
    # stride-2-kept voxels valid).

    # --- conv11/conv22: 1x1x1 conv + BN + ReLU ---
    h1 = jnp.maximum(
        jnp.dot(a1.astype(cw_ref.dtype), cw_ref[0],
                preferred_element_type=jnp.float32) + cb_ref[0], 0.0)
    h2 = jnp.maximum(
        jnp.dot(a2.astype(cw_ref.dtype), cw_ref[1],
                preferred_element_type=jnp.float32) + cb_ref[1], 0.0)
    # TODO(synk): Spatial_Enhance_Module / Spectral_Enhance_Module definitions are
    # not provided; treated as identity on (h1, h2).

    # --- FusionLayer: cat([h1, h2], channels) @ Wf  (single K=2*a0 MXU dot) ---
    hcat = jnp.concatenate(
        [h1.astype(wf_ref.dtype), h2.astype(wf_ref.dtype)], axis=-1)   # (ts, 2*a0)
    f = jnp.maximum(
        jnp.dot(hcat, wf_ref[...], preferred_element_type=jnp.float32) + bf_ref[...],
        0.0)                                                            # (ts, a0)

    if masked:  # zero rows that only exist because S was padded to a tile multiple
        rows = t * ts + lax.broadcasted_iota(jnp.int32, (ts, 1), 0)
        f = jnp.where(rows < s_valid, f, 0.0)

    acc_ref[...] += jnp.sum(f, axis=0, keepdims=True)                  # (1, a0)

    # --- AdaptiveAvgPool + Flatten + Linear: only on the last spatial tile ---
    @pl.when(t == pl.num_programs(1) - 1)
    def _():
        feat = acc_ref[...] * inv_s                                    # (1, a0) f32
        feat_ref[0] = feat.astype(feat_ref.dtype)
        logits = (jnp.dot(feat.astype(lw_ref.dtype), lw_ref[...],
                          preferred_element_type=jnp.float32) + lb_ref[...])
        logits_ref[0] = logits.astype(logits_ref.dtype)


def fused_prtnet(xp, wts, *, s_valid, ts):
    """xp: (2, B, S_pad, p3) bf16.  Returns (feat (B, a0) f32, logits (B, ncls) f32)."""
    _, B, S_pad, p3 = xp.shape
    dim = wts["pe_w"].shape[-1]
    a0 = wts["cw"].shape[-1]
    ncls = wts["lw"].shape[-1]
    n_t = S_pad // ts

    flops = (2 * 2 * B * S_pad * p3 * dim            # patch embed, both streams
             + 2 * 2 * B * S_pad * dim * a0          # conv11 / conv22
             + 2 * B * S_pad * (2 * a0) * a0         # fusion layer
             + 2 * B * a0 * ncls)                    # linear head
    bytes_acc = (xp.size * 2 + wts["pe_w"].size * 2 + wts["pe_b"].size * 4
                 + wts["cw"].size * 2 + wts["cb"].size * 4
                 + wts["wf"].size * 2 + wts["bf"].size * 4
                 + wts["lw"].size * 2 + wts["lb"].size * 4
                 + B * a0 * 4 + B * ncls * 4)

    feat, logits = pl.pallas_call(
        functools.partial(_prtnet_kernel, ts=ts, s_valid=s_valid,
                          inv_s=1.0 / s_valid, masked=(S_pad != s_valid)),
        out_shape=(jax.ShapeDtypeStruct((B, 1, a0), jnp.float32),
                   jax.ShapeDtypeStruct((B, 1, ncls), jnp.float32)),
        grid=(B, n_t),
        in_specs=[
            pl.BlockSpec((2, 1, ts, p3), lambda b, t: (0, b, t, 0)),
            pl.BlockSpec((2, p3, dim), lambda b, t: (0, 0, 0)),
            pl.BlockSpec((2, 1, dim), lambda b, t: (0, 0, 0)),
            pl.BlockSpec((2, dim, a0), lambda b, t: (0, 0, 0)),
            pl.BlockSpec((2, 1, a0), lambda b, t: (0, 0, 0)),
            pl.BlockSpec((2 * a0, a0), lambda b, t: (0, 0)),
            pl.BlockSpec((1, a0), lambda b, t: (0, 0)),
            pl.BlockSpec((a0, ncls), lambda b, t: (0, 0)),
            pl.BlockSpec((1, ncls), lambda b, t: (0, 0)),
        ],
        out_specs=(
            pl.BlockSpec((1, 1, a0), lambda b, t: (b, 0, 0)),
            pl.BlockSpec((1, 1, ncls), lambda b, t: (b, 0, 0)),
        ),
        scratch_shapes=[pltpu.VMEM((1, a0), jnp.float32)],
        compiler_params=pltpu.CompilerParams(
            dimension_semantics=("parallel", "arbitrary"),
            vmem_limit_bytes=VMEM_LIMIT),
        cost_estimate=pl.CostEstimate(
            flops=flops, transcendentals=0, bytes_accessed=bytes_acc),
    )(xp, wts["pe_w"], wts["pe_b"], wts["cw"], wts["cb"],
      wts["wf"], wts["bf"], wts["lw"], wts["lb"])
    return feat.reshape(B, a0), logits.reshape(B, ncls)


# ----------------------------------------------------------------------------
# Parameters (deterministic synthetic init; shapes follow PRTNet.__init__)
# ----------------------------------------------------------------------------
def init_params(key, *, dim, patch, a0, n_classes):
    p3 = patch ** 3
    ks = jax.random.split(key, 12)

    def kaiming(k, shape, fan_out):
        return jnp.sqrt(2.0 / fan_out) * jax.random.normal(k, shape, jnp.float32)

    def bn(n):
        return dict(gamma=jnp.ones((n,), jnp.float32), beta=jnp.zeros((n,), jnp.float32),
                    mean=jnp.zeros((n,), jnp.float32), var=jnp.ones((n,), jnp.float32))

    return {
        "con1_w": kaiming(ks[0], (p3, dim), dim),
        "con1_b": 0.01 * jax.random.normal(ks[1], (dim,), jnp.float32),
        "con2_w": kaiming(ks[2], (p3, dim), dim),
        "con2_b": 0.01 * jax.random.normal(ks[3], (dim,), jnp.float32),
        "conv11_w": kaiming(ks[4], (dim, a0), a0),
        "conv11_b": 0.01 * jax.random.normal(ks[5], (a0,), jnp.float32),
        "conv22_w": kaiming(ks[6], (dim, a0), a0),
        "conv22_b": 0.01 * jax.random.normal(ks[7], (a0,), jnp.float32),
        "fusion_w": kaiming(ks[8], (2 * a0, a0), a0),
        "fusion_b": 0.01 * jax.random.normal(ks[9], (a0,), jnp.float32),
        "lin_w": 0.1 * jax.random.normal(ks[10], (a0, n_classes), jnp.float32),
        "lin_b": jnp.zeros((n_classes,), jnp.float32),
        "bn_dim": bn(dim), "bn_a0": bn(a0), "bn_fuse": bn(a0),
    }


def prepare_weights(params):
    """Fold eval-mode BN into weights/bias and pack per-stream weight stacks.
    Call once OUTSIDE jit (pure host-side prep)."""
    w1, b1 = fold_bn(params["con1_w"], params["con1_b"], **params["bn_dim"])
    w2, b2 = fold_bn(params["con2_w"], params["con2_b"], **params["bn_dim"])
    w11, b11 = fold_bn(params["conv11_w"], params["conv11_b"], **params["bn_a0"])
    w22, b22 = fold_bn(params["conv22_w"], params["conv22_b"], **params["bn_a0"])
    wf, bf = fold_bn(params["fusion_w"], params["fusion_b"], **params["bn_fuse"])
    return dict(
        pe_w=jnp.stack([w1, w2]).astype(jnp.bfloat16),      # (2, p3, dim)
        pe_b=jnp.stack([b1, b2])[:, None, :],               # (2, 1, dim) f32
        cw=jnp.stack([w11, w22]).astype(jnp.bfloat16),      # (2, dim, a0)
        cb=jnp.stack([b11, b22])[:, None, :],               # (2, 1, a0) f32
        wf=wf.astype(jnp.bfloat16),                         # (2*a0, a0), un-split
        bf=bf[None, :],                                     # (1, a0) f32
        lw=params["lin_w"].astype(jnp.bfloat16),            # (a0, ncls) bf16
        lb=params["lin_b"][None, :],                        # (1, ncls) f32
    )


# ----------------------------------------------------------------------------
# Forward pass (mirrors PRTNet.forward; returns (flattened pooled feat, logits))
# ----------------------------------------------------------------------------
def prtnet_forward(wts, x1, x2, *, patch):
    p3 = patch ** 3
    dim = wts["pe_w"].shape[-1]
    a0 = wts["cw"].shape[-1]

    # im2col restricted to the voxels the stride-2 conv11/conv22 keep
    # (ConvMix1/2 identity => the other 7/8 of the embedding is never read).
    xp1, S = _im2col_sel(x1.astype(jnp.bfloat16), patch)
    xp2, _ = _im2col_sel(x2.astype(jnp.bfloat16), patch)

    ts = _pick_tile(S, dim, a0, p3)
    S_pad = _round_up(S, ts)
    if S_pad != S:
        pad = ((0, 0), (0, S_pad - S), (0, 0))
        xp1 = jnp.pad(xp1, pad)
        xp2 = jnp.pad(xp2, pad)
    xp = jnp.stack([xp1, xp2])                       # (2, B, S_pad, p3) bf16

    return fused_prtnet(xp, wts, s_valid=S, ts=ts)


if __name__ == "__main__":
    # Small synthetic shapes consistent with the module structure
    # (channel widths chosen lane-aligned at 128 per the perf guidance).
    B, DIM, PATCH, A0, NCLS = 2, 128, 2, 128, 2
    Dsp = Hsp = Wsp = 8  # input volume (divisible by patch size)

    key = jax.random.PRNGKey(0)
    k_p, k_x1, k_x2 = jax.random.split(key, 3)
    params = init_params(k_p, dim=DIM, patch=PATCH, a0=A0, n_classes=NCLS)
    wts = prepare_weights(params)        # hoisted: BN fold / packing runs once

    x1 = jax.random.normal(k_x1, (B, 1, Dsp, Hsp, Wsp), jnp.float32)  # NCDHW
    x2 = jax.random.normal(k_x2, (B, 1, Dsp, Hsp, Wsp), jnp.float32)  # NCDHW

    fwd = jax.jit(functools.partial(prtnet_forward, patch=PATCH))
    feat, logits = fwd(wts, x1, x2)
    jax.block_until_ready((feat, logits))

    assert feat.shape == (B, A0)
    assert logits.shape == (B, NCLS)
    assert bool(jnp.all(jnp.isfinite(feat))) and bool(jnp.all(jnp.isfinite(logits)))
    print("KERNEL_OK")
</pallas_src>

<mosaic_0001>
module attributes {stable_mosaic.version = 11 : i64} {
  func.func @_prtnet_kernel(%arg0: i32, %arg1: i32, %arg2: memref<2x1x16x8xbf16, #tpu.memory_space<vmem>>, %arg3: memref<2x8x128xbf16, #tpu.memory_space<vmem>>, %arg4: memref<2x1x128xf32, #tpu.memory_space<vmem>>, %arg5: memref<2x128x128xbf16, #tpu.memory_space<vmem>>, %arg6: memref<2x1x128xf32, #tpu.memory_space<vmem>>, %arg7: memref<256x128xbf16, #tpu.memory_space<vmem>>, %arg8: memref<1x128xf32, #tpu.memory_space<vmem>>, %arg9: memref<128x2xbf16, #tpu.memory_space<vmem>>, %arg10: memref<1x2xf32, #tpu.memory_space<vmem>>, %arg11: memref<1x1x128xf32, #tpu.memory_space<vmem>>, %arg12: memref<1x1x2xf32, #tpu.memory_space<vmem>>, %arg13: memref<1x128xf32, #tpu.memory_space<vmem>>) attributes {dimension_semantics = [#tpu.dimension_semantics<parallel>, #tpu.dimension_semantics<arbitrary>], iteration_bounds = array<i64: 2, 1>, scalar_prefetch = 0 : i64, scratch_operands = 1 : i64, tpu.core_type = #tpu.core_type<tc>, window_params = [{transform_indices = @transform_0, window_bounds = array<i64: 2, 1, 16, 8>}, {pipeline_mode = #tpu.pipeline_mode<synchronous>, transform_indices = @transform_1, window_bounds = array<i64: 2, 8, 128>}, {pipeline_mode = #tpu.pipeline_mode<synchronous>, transform_indices = @transform_2, window_bounds = array<i64: 2, 1, 128>}, {pipeline_mode = #tpu.pipeline_mode<synchronous>, transform_indices = @transform_3, window_bounds = array<i64: 2, 128, 128>}, {pipeline_mode = #tpu.pipeline_mode<synchronous>, transform_indices = @transform_4, window_bounds = array<i64: 2, 1, 128>}, {pipeline_mode = #tpu.pipeline_mode<synchronous>, transform_indices = @transform_5, window_bounds = array<i64: 256, 128>}, {pipeline_mode = #tpu.pipeline_mode<synchronous>, transform_indices = @transform_6, window_bounds = array<i64: 1, 128>}, {pipeline_mode = #tpu.pipeline_mode<synchronous>, transform_indices = @transform_7, window_bounds = array<i64: 128, 2>}, {pipeline_mode = #tpu.pipeline_mode<synchronous>, transform_indices = @transform_8, window_bounds = array<i64: 1, 2>}, {transform_indices = @transform_9, window_bounds = array<i64: 1, 1, 128>}, {transform_indices = @transform_10, window_bounds = array<i64: 1, 1, 2>}]} {
    %c0_i32 = arith.constant 0 : i32
    %0 = arith.cmpi eq, %arg1, %c0_i32 : i32
    %1 = arith.extui %0 : i1 to i32
    %c0_i32_0 = arith.constant 0 : i32
    %2 = arith.cmpi ne, %1, %c0_i32_0 : i32
    scf.if %2 {
      %cst_52 = arith.constant 0.000000e+00 : f32
      %73 = vector.broadcast %cst_52 : f32 to vector<1x128xf32>
      %c0_53 = arith.constant 0 : index
      %c0_54 = arith.constant 0 : index
      %74 = vector.load %arg13[%c0_53, %c0_54] : memref<1x128xf32, #tpu.memory_space<vmem>>, vector<1x128xf32>
      tpu.vector_store %arg13[%c0_53, %c0_54], %73 {strides = array<i32>} : memref<1x128xf32, #tpu.memory_space<vmem>>, vector<1x128xf32>,
    } else {
    }
    %c0 = arith.constant 0 : index
    %c0_1 = arith.constant 0 : index
    %c0_2 = arith.constant 0 : index
    %c0_3 = arith.constant 0 : index
    %3 = vector.load %arg2[%c0, %c0_1, %c0_2, %c0_3] : memref<2x1x16x8xbf16, #tpu.memory_space<vmem>>, vector<1x1x16x8xbf16>
    %4 = vector.shape_cast %3 : vector<1x1x16x8xbf16> to vector<16x8xbf16>
    %c1 = arith.constant 1 : index
    %c0_4 = arith.constant 0 : index
    %c0_5 = arith.constant 0 : index
    %c0_6 = arith.constant 0 : index
    %5 = vector.load %arg2[%c1, %c0_4, %c0_5, %c0_6] : memref<2x1x16x8xbf16, #tpu.memory_space<vmem>>, vector<1x1x16x8xbf16>
    %6 = vector.shape_cast %5 : vector<1x1x16x8xbf16> to vector<16x8xbf16>
    %c0_7 = arith.constant 0 : index
    %c0_8 = arith.constant 0 : index
    %c0_9 = arith.constant 0 : index
    %7 = vector.load %arg3[%c0_7, %c0_8, %c0_9] : memref<2x8x128xbf16, #tpu.memory_space<vmem>>, vector<1x8x128xbf16>
    %8 = vector.shape_cast %7 : vector<1x8x128xbf16> to vector<8x128xbf16>
    %cst = arith.constant dense<0.000000e+00> : vector<16x128xf32>
    %9 = tpu.matmul %4, %8, %cst {dimension_numbers = #tpu.dot_dimension_numbers<[1], [0], [0], [1], [0, 0, 1, 1], [], []>} : vector<16x8xbf16>, vector<8x128xbf16>, vector<16x128xf32> -> vector<16x128xf32>
    %c0_10 = arith.constant 0 : index
    %c0_11 = arith.constant 0 : index
    %c0_12 = arith.constant 0 : index
    %10 = vector.load %arg4[%c0_10, %c0_11, %c0_12] : memref<2x1x128xf32, #tpu.memory_space<vmem>>, vector<1x1x128xf32>
    %11 = vector.shape_cast %10 : vector<1x1x128xf32> to vector<1x128xf32>
    %12 = vector.broadcast %11 : vector<1x128xf32> to vector<16x128xf32>
    %13 = arith.addf %9, %12 : vector<16x128xf32>
    %cst_13 = arith.constant 0.000000e+00 : f32
    %14 = vector.broadcast %cst_13 : f32 to vector<16x128xf32>
    %15 = arith.maximumf %13, %14 : vector<16x128xf32>
    %c1_14 = arith.constant 1 : index
    %c0_15 = arith.constant 0 : index
    %c0_16 = arith.constant 0 : index
    %16 = vector.load %arg3[%c1_14, %c0_15, %c0_16] : memref<2x8x128xbf16, #tpu.memory_space<vmem>>, vector<1x8x128xbf16>
    %17 = vector.shape_cast %16 : vector<1x8x128xbf16> to vector<8x128xbf16>
    %cst_17 = arith.constant dense<0.000000e+00> : vector<16x128xf32>
    %18 = tpu.matmul %6, %17, %cst_17 {dimension_numbers = #tpu.dot_dimension_numbers<[1], [0], [0], [1], [0, 0, 1, 1], [], []>} : vector<16x8xbf16>, vector<8x128xbf16>, vector<16x128xf32> -> vector<16x128xf32>
    %c1_18 = arith.constant 1 : index
    %c0_19 = arith.constant 0 : index
    %c0_20 = arith.constant 0 : index
    %19 = vector.load %arg4[%c1_18, %c0_19, %c0_20] : memref<2x1x128xf32, #tpu.memory_space<vmem>>, vector<1x1x128xf32>
    %20 = vector.shape_cast %19 : vector<1x1x128xf32> to vector<1x128xf32>
    %21 = vector.broadcast %20 : vector<1x128xf32> to vector<16x128xf32>
    %22 = arith.addf %18, %21 : vector<16x128xf32>
    %cst_21 = arith.constant 0.000000e+00 : f32
    %23 = vector.broadcast %cst_21 : f32 to vector<16x128xf32>
    %24 = arith.maximumf %22, %23 : vector<16x128xf32>
    %25 = arith.truncf %15 : vector<16x128xf32> to vector<16x128xbf16>
    %c0_22 = arith.constant 0 : index
    %c0_23 = arith.constant 0 : index
    %c0_24 = arith.constant 0 : index
    %26 = vector.load %arg5[%c0_22, %c0_23, %c0_24] : memref<2x128x128xbf16, #tpu.memory_space<vmem>>, vector<1x128x128xbf16>
    %27 = vector.shape_cast %26 : vector<1x128x128xbf16> to vector<128x128xbf16>
    %cst_25 = arith.constant dense<0.000000e+00> : vector<16x128xf32>
    %28 = tpu.matmul %25, %27, %cst_25 {dimension_numbers = #tpu.dot_dimension_numbers<[1], [0], [0], [1], [0, 0, 1, 1], [], []>} : vector<16x128xbf16>, vector<128x128xbf16>, vector<16x128xf32> -> vector<16x128xf32>
    %c0_26 = arith.constant 0 : index
    %c0_27 = arith.constant 0 : index
    %c0_28 = arith.constant 0 : index
    %29 = vector.load %arg6[%c0_26, %c0_27, %c0_28] : memref<2x1x128xf32, #tpu.memory_space<vmem>>, vector<1x1x128xf32>
    %30 = vector.shape_cast %29 : vector<1x1x128xf32> to vector<1x128xf32>
    %31 = vector.broadcast %30 : vector<1x128xf32> to vector<16x128xf32>
    %32 = arith.addf %28, %31 : vector<16x128xf32>
    %cst_29 = arith.constant 0.000000e+00 : f32
    %33 = vector.broadcast %cst_29 : f32 to vector<16x128xf32>
    %34 = arith.maximumf %32, %33 : vector<16x128xf32>
    %35 = arith.truncf %24 : vector<16x128xf32> to vector<16x128xbf16>
    %c1_30 = arith.constant 1 : index
    %c0_31 = arith.constant 0 : index
    %c0_32 = arith.constant 0 : index
    %36 = vector.load %arg5[%c1_30, %c0_31, %c0_32] : memref<2x128x128xbf16, #tpu.memory_space<vmem>>, vector<1x128x128xbf16>
    %37 = vector.shape_cast %36 : vector<1x128x128xbf16> to vector<128x128xbf16>
    %cst_33 = arith.constant dense<0.000000e+00> : vector<16x128xf32>
    %38 = tpu.matmul %35, %37, %cst_33 {dimension_numbers = #tpu.dot_dimension_numbers<[1], [0], [0], [1], [0, 0, 1, 1], [], []>} : vector<16x128xbf16>, vector<128x128xbf16>, vector<16x128xf32> -> vector<16x128xf32>
    %c1_34 = arith.constant 1 : index
    %c0_35 = arith.constant 0 : index
    %c0_36 = arith.constant 0 : index
    %39 = vector.load %arg6[%c1_34, %c0_35, %c0_36] : memref<2x1x128xf32, #tpu.memory_space<vmem>>, vector<1x1x128xf32>
    %40 = vector.shape_cast %39 : vector<1x1x128xf32> to vector<1x128xf32>
    %41 = vector.broadcast %40 : vector<1x128xf32> to vector<16x128xf32>
    %42 = arith.addf %38, %41 : vector<16x128xf32>
    %cst_37 = arith.constant 0.000000e+00 : f32
    %43 = vector.broadcast %cst_37 : f32 to vector<16x128xf32>
    %44 = arith.maximumf %42, %43 : vector<16x128xf32>
    %45 = arith.truncf %34 : vector<16x128xf32> to vector<16x128xbf16>
    %46 = arith.truncf %44 : vector<16x128xf32> to vector<16x128xbf16>
    %47 = tpu.concatenate %45, %46 in 1 : vector<16x128xbf16>, vector<16x128xbf16> -> vector<16x256xbf16>
    %c0_38 = arith.constant 0 : index
    %c0_39 = arith.constant 0 : index
    %48 = vector.load %arg7[%c0_38, %c0_39] : memref<256x128xbf16, #tpu.memory_space<vmem>>, vector<256x128xbf16>
    %cst_40 = arith.constant dense<0.000000e+00> : vector<16x128xf32>
    %49 = tpu.matmul %47, %48, %cst_40 {dimension_numbers = #tpu.dot_dimension_numbers<[1], [0], [0], [1], [0, 0, 1, 1], [], []>} : vector<16x256xbf16>, vector<256x128xbf16>, vector<16x128xf32> -> vector<16x128xf32>
    %c0_41 = arith.constant 0 : index
    %c0_42 = arith.constant 0 : index
    %50 = vector.load %arg8[%c0_41, %c0_42] : memref<1x128xf32, #tpu.memory_space<vmem>>, vector<1x128xf32>
    %51 = vector.broadcast %50 : vector<1x128xf32> to vector<16x128xf32>
    %52 = arith.addf %49, %51 : vector<16x128xf32>
    %cst_43 = arith.constant 0.000000e+00 : f32
    %53 = vector.broadcast %cst_43 : f32 to vector<16x128xf32>
    %54 = arith.maximumf %52, %53 : vector<16x128xf32>
    %c16_i32 = arith.constant 16 : i32
    %55 = arith.muli %arg1, %c16_i32 : i32
    %56 = tpu.iota {dimensions = array<i32: 0>} : vector<16x1xi32>
    %57 = vector.broadcast %55 : i32 to vector<16x1xi32>
    %58 = arith.addi %57, %56 : vector<16x1xi32>
    %c8_i32 = arith.constant 8 : i32
    %59 = vector.broadcast %c8_i32 : i32 to vector<16x1xi32>
    %60 = arith.cmpi slt, %58, %59 : vector<16x1xi32>
    %cst_44 = arith.constant 0.000000e+00 : f32
    %61 = vector.shape_cast %60 : vector<16x1xi1> to vector<16x1xi1>
    %62 = vector.broadcast %61 : vector<16x1xi1> to vector<16x128xi1>
    %63 = vector.broadcast %cst_44 : f32 to vector<16x128xf32>
    %64 = arith.select %62, %54, %63 : vector<16x128xi1>, vector<16x128xf32>
    %c0_45 = arith.constant 0 : index
    %c0_46 = arith.constant 0 : index
    %65 = vector.load %arg13[%c0_45, %c0_46] : memref<1x128xf32, #tpu.memory_space<vmem>>, vector<1x128xf32>
    %cst_47 = arith.constant dense<0.000000e+00> : vector<128xf32>
    %66 = vector.multi_reduction <add>, %64, %cst_47 [0] : vector<16x128xf32> to vector<128xf32>
    %67 = vector.shape_cast %66 : vector<128xf32> to vector<1x128xf32>
    %68 = arith.addf %65, %67 : vector<1x128xf32>
    %c0_48 = arith.constant 0 : index
    %c0_49 = arith.constant 0 : index
    %69 = vector.load %arg13[%c0_48, %c0_49] : memref<1x128xf32, #tpu.memory_space<vmem>>, vector<1x128xf32>
    tpu.vector_store %arg13[%c0_48, %c0_49], %68 {strides = array<i32>} : memref<1x128xf32, #tpu.memory_space<vmem>>, vector<1x128xf32>,
    %c0_i32_50 = arith.constant 0 : i32
    %70 = arith.cmpi eq, %arg1, %c0_i32_50 : i32
    %71 = arith.extui %70 : i1 to i32
    %c0_i32_51 = arith.constant 0 : i32
    %72 = arith.cmpi ne, %71, %c0_i32_51 : i32
    scf.if %72 {
      %c0_52 = arith.constant 0 : index
      %c0_53 = arith.constant 0 : index
      %73 = vector.load %arg13[%c0_52, %c0_53] : memref<1x128xf32, #tpu.memory_space<vmem>>, vector<1x128xf32>
      %cst_54 = arith.constant 1.250000e-01 : f32
      %74 = vector.broadcast %cst_54 : f32 to vector<1x128xf32>
      %75 = arith.mulf %73, %74 : vector<1x128xf32>
      %c0_55 = arith.constant 0 : index
      %c0_56 = arith.constant 0 : index
      %c0_57 = arith.constant 0 : index
      %76 = vector.load %arg11[%c0_55, %c0_56, %c0_57] : memref<1x1x128xf32, #tpu.memory_space<vmem>>, vector<1x1x128xf32>
      %77 = vector.shape_cast %76 : vector<1x1x128xf32> to vector<1x128xf32>
      %78 = vector.shape_cast %75 : vector<1x128xf32> to vector<1x1x128xf32>
      tpu.vector_store %arg11[%c0_55, %c0_56, %c0_57], %78 {strides = array<i32>} : memref<1x1x128xf32, #tpu.memory_space<vmem>>, vector<1x1x128xf32>,
      %79 = arith.truncf %75 : vector<1x128xf32> to vector<1x128xbf16>
      %c0_58 = arith.constant 0 : index
      %c0_59 = arith.constant 0 : index
      %80 = vector.load %arg9[%c0_58, %c0_59] : memref<128x2xbf16, #tpu.memory_space<vmem>>, vector<128x2xbf16>
      %cst_60 = arith.constant dense<0.000000e+00> : vector<1x2xf32>
      %81 = tpu.matmul %79, %80, %cst_60 {dimension_numbers = #tpu.dot_dimension_numbers<[1], [0], [0], [1], [0, 0, 1, 1], [], []>} : vector<1x128xbf16>, vector<128x2xbf16>, vector<1x2xf32> -> vector<1x2xf32>
      %c0_61 = arith.constant 0 : index
      %c0_62 = arith.constant 0 : index
      %82 = vector.load %arg10[%c0_61, %c0_62] : memref<1x2xf32, #tpu.memory_space<vmem>>, vector<1x2xf32>
      %83 = arith.addf %81, %82 : vector<1x2xf32>
      %c0_63 = arith.constant 0 : index
      %c0_64 = arith.constant 0 : index
      %c0_65 = arith.constant 0 : index
      %84 = vector.load %arg12[%c0_63, %c0_64, %c0_65] : memref<1x1x2xf32, #tpu.memory_space<vmem>>, vector<1x1x2xf32>
      %85 = vector.shape_cast %84 : vector<1x1x2xf32> to vector<1x2xf32>
      %86 = vector.shape_cast %83 : vector<1x2xf32> to vector<1x1x2xf32>
      tpu.vector_store %arg12[%c0_63, %c0_64, %c0_65], %86 {strides = array<i32>} : memref<1x1x2xf32, #tpu.memory_space<vmem>>, vector<1x1x2xf32>,
    } else {
    }
    return
  }
  func.func @transform_0(%arg0: i32, %arg1: i32) -> (i32, i32, i32, i32) {
    %c0_i32 = arith.constant 0 : i32
    %c0_i32_0 = arith.constant 0 : i32
    %c0_i32_1 = arith.constant 0 : i32
    return %c0_i32, %arg0, %arg1, %c0_i32_0 : i32, i32, i32, i32
  }
  func.func @transform_1(%arg0: i32, %arg1: i32) -> (i32, i32, i32) {
    %c0_i32 = arith.constant 0 : i32
    %c0_i32_0 = arith.constant 0 : i32
    %c0_i32_1 = arith.constant 0 : i32
    %c0_i32_2 = arith.constant 0 : i32
    return %c0_i32, %c0_i32_0, %c0_i32_1 : i32, i32, i32
  }
  func.func @transform_2(%arg0: i32, %arg1: i32) -> (i32, i32, i32) {
    %c0_i32 = arith.constant 0 : i32
    %c0_i32_0 = arith.constant 0 : i32
    %c0_i32_1 = arith.constant 0 : i32
    %c0_i32_2 = arith.constant 0 : i32
    return %c0_i32, %c0_i32_0, %c0_i32_1 : i32, i32, i32
  }
  func.func @transform_3(%arg0: i32, %arg1: i32) -> (i32, i32, i32) {
    %c0_i32 = arith.constant 0 : i32
    %c0_i32_0 = arith.constant 0 : i32
    %c0_i32_1 = arith.constant 0 : i32
    %c0_i32_2 = arith.constant 0 : i32
    return %c0_i32, %c0_i32_0, %c0_i32_1 : i32, i32, i32
  }
  func.func @transform_4(%arg0: i32, %arg1: i32) -> (i32, i32, i32) {
    %c0_i32 = arith.constant 0 : i32
    %c0_i32_0 = arith.constant 0 : i32
    %c0_i32_1 = arith.constant 0 : i32
    %c0_i32_2 = arith.constant 0 : i32
    return %c0_i32, %c0_i32_0, %c0_i32_1 : i32, i32, i32
  }
  func.func @transform_5(%arg0: i32, %arg1: i32) -> (i32, i32) {
    %c0_i32 = arith.constant 0 : i32
    %c0_i32_0 = arith.constant 0 : i32
    %c0_i32_1 = arith.constant 0 : i32
    return %c0_i32, %c0_i32_0 : i32, i32
  }
  func.func @transform_6(%arg0: i32, %arg1: i32) -> (i32, i32) {
    %c0_i32 = arith.constant 0 : i32
    %c0_i32_0 = arith.constant 0 : i32
    %c0_i32_1 = arith.constant 0 : i32
    return %c0_i32, %c0_i32_0 : i32, i32
  }
  func.func @transform_7(%arg0: i32, %arg1: i32) -> (i32, i32) {
    %c0_i32 = arith.constant 0 : i32
    %c0_i32_0 = arith.constant 0 : i32
    %c0_i32_1 = arith.constant 0 : i32
    return %c0_i32, %c0_i32_0 : i32, i32
  }
  func.func @transform_8(%arg0: i32, %arg1: i32) -> (i32, i32) {
    %c0_i32 = arith.constant 0 : i32
    %c0_i32_0 = arith.constant 0 : i32
    %c0_i32_1 = arith.constant 0 : i32
    return %c0_i32, %c0_i32_0 : i32, i32
  }
  func.func @transform_9(%arg0: i32, %arg1: i32) -> (i32, i32, i32) {
    %c0_i32 = arith.constant 0 : i32
    %c0_i32_0 = arith.constant 0 : i32
    %c0_i32_1 = arith.constant 0 : i32
    return %arg0, %c0_i32, %c0_i32_0 : i32, i32, i32
  }
  func.func @transform_10(%arg0: i32, %arg1: i32) -> (i32, i32, i32) {
    %c0_i32 = arith.constant 0 : i32
    %c0_i32_0 = arith.constant 0 : i32
    %c0_i32_1 = arith.constant 0 : i32
    return %arg0, %c0_i32, %c0_i32_0 : i32, i32, i32
  }
}

</mosaic_0001>

<bundles_post_ra>
// kernel: squeeze.2
= control target key start
LH: loop header
LB: loop body
LE: loop exit
PB: predicated region body
PF: predicated region fallthrough
CT: control target
= control target key end

     0   :  { %vm258_vm0 = vcmask 15360   ;;  %s2137_s22 = smov 124   ;;  %s2138_s23 = smov 122   ;;  %s2831_s0 = inlined_call_operand.vmem [shape: bf16[2,1,8,8,8], index: 0, kind: input, shape index: {}]   ;;  %s2832_s1 = inlined_call_operand.vmem [shape: bf16[2,4,2,4,2,4,2], index: 1, kind: output, shape index: {}]  }
   0x1   :  { %v2002_v0 = vld [vmem:[%s2831_s0] sm:$0xff]   ;;  %v2010_v1 = vld [vmem:[%s2831_s0 + $0x10] sm:$0xff]   ;;  %v2011_v2 = vld [vmem:[%s2831_s0 + $0x8] sm:$0xff]  }
   0x2   :  { %v2003_v3 = vunpack.c.l.bf16 %v2002_v0  ;;  %v2004_v4 = vunpack.c.h.bf16 %v2002_v0  ;;  %v1995_v5 = vunpack.c.l.bf16 %v2010_v1  ;;  %v1996_v6 = vunpack.c.h.bf16 %v2010_v1  ;;  %v2009_v7 = vld [vmem:[%s2831_s0 + $0x18] sm:$0xff]   ;;  %v2008_v8 = vld [vmem:[%s2831_s0 + $0x20] sm:$0xff]   ;;  %v2007_v9 = vld [vmem:[%s2831_s0 + $0x28] sm:$0xff]  }
   0x3   :  { %v1999_v10 = vunpack.c.l.bf16 %v2011_v2  ;;  %v2000_v11 = vunpack.c.h.bf16 %v2011_v2  ;;  %v1991_v12 = vunpack.c.l.bf16 %v2009_v7  ;;  %v1992_v13 = vunpack.c.h.bf16 %v2009_v7  ;;  %v2006_v14 = vld [vmem:[%s2831_s0 + $0x30] sm:$0xff]   ;;  %v2005_v15 = vld [vmem:[%s2831_s0 + $0x38] sm:$0xff]   ;;  %s2136_s0 = smov 126  }
   0x4   :  { %265 = vst.msk [vmem:[#allocation0 + $0x40] ss:$8 sm:$0xf] %vm258_vm0, %v2004_v4   ;;  %267 = vst.msk [vmem:[#allocation0 + $0x40] ss:$8 sm:$0xf0] %vm258_vm0, %v2004_v4   ;;  %v2176_v16 = vpack.i.bf16 %v2004_v4, %v2003_v3  ;;  %v2026_v17 = vpack.i.bf16 %v1996_v6, %v1995_v5  ;;  %v1987_v18 = vunpack.c.l.bf16 %v2008_v8  ;;  %v1988_v19 = vunpack.c.h.bf16 %v2008_v8 }
   0x5   :  { %259 = vst.msk [vmem:[#allocation0] ss:$8 sm:$0xf] %vm258_vm0, %v2003_v3   ;;  %260 = vst.msk [vmem:[#allocation0] ss:$8 sm:$0xf0] %vm258_vm0, %v2003_v3   ;;  %v2021_v20 = vpack.i.bf16 %v2000_v11, %v1999_v10  ;;  %v1983_v21 = vunpack.c.l.bf16 %v2007_v9  ;;  %v1984_v22 = vunpack.c.h.bf16 %v2007_v9  ;;  %v2031_v23 = vpack.i.bf16 %v1992_v13, %v1991_v12 }
   0x6   :  { %293 = vst.msk [vmem:[#allocation0 + $0x140] ss:$8 sm:$0xf] %vm258_vm0, %v1996_v6   ;;  %295 = vst.msk [vmem:[#allocation0 + $0x140] ss:$8 sm:$0xf0] %vm258_vm0, %v1996_v6   ;;  %2017 = vrot.lane.b32.xlu0 %v2176_v16, %s2136_s0  ;;  %2027 = vrot.lane.b32.xlu1 %v2026_v17, %s2136_s0  ;;  %v1979_v24 = vunpack.c.l.bf16 %v2006_v14  ;;  %v1980_v25 = vunpack.c.h.bf16 %v2006_v14  ;;  %v1975_v26 = vunpack.c.l.bf16 %v2005_v15  ;;  %v1976_v27 = vunpack.c.h.bf16 %v2005_v15 }
   0x7   :  { %286 = vst.msk [vmem:[#allocation0 + $0x100] ss:$8 sm:$0xf] %vm258_vm0, %v1995_v5   ;;  %288 = vst.msk [vmem:[#allocation0 + $0x100] ss:$8 sm:$0xf0] %vm258_vm0, %v1995_v5   ;;  %v2036_v28 = vpack.i.bf16 %v1988_v19, %v1987_v18  ;;  %v2041_v29 = vpack.i.bf16 %v1984_v22, %v1983_v21 }
   0x8   :  { %272 = vst.msk [vmem:[#allocation0 + $0x80] ss:$8 sm:$0xf] %vm258_vm0, %v1999_v10   ;;  %274 = vst.msk [vmem:[#allocation0 + $0x80] ss:$8 sm:$0xf0] %vm258_vm0, %v1999_v10   ;;  %v2046_v30 = vpack.i.bf16 %v1980_v25, %v1979_v24  ;;  %v2051_v31 = vpack.i.bf16 %v1976_v27, %v1975_v26 }
   0x9   :  { %279 = vst.msk [vmem:[#allocation0 + $0xc0] ss:$8 sm:$0xf] %vm258_vm0, %v2000_v11   ;;  %281 = vst.msk [vmem:[#allocation0 + $0xc0] ss:$8 sm:$0xf0] %vm258_vm0, %v2000_v11  }
   0xa   :  { %300 = vst.msk [vmem:[#allocation0 + $0x180] ss:$8 sm:$0xf] %vm258_vm0, %v1991_v12   ;;  %302 = vst.msk [vmem:[#allocation0 + $0x180] ss:$8 sm:$0xf0] %vm258_vm0, %v1991_v12   ;;  %2022 = vrot.lane.b32.xlu0 %v2021_v20, %s2136_s0  ;;  %2032 = vrot.lane.b32.xlu1 %v2031_v23, %s2136_s0 }
   0xb   :  { %307 = vst.msk [vmem:[#allocation0 + $0x1c0] ss:$8 sm:$0xf] %vm258_vm0, %v1992_v13   ;;  %309 = vst.msk [vmem:[#allocation0 + $0x1c0] ss:$8 sm:$0xf0] %vm258_vm0, %v1992_v13  }
   0xc   :  { %314 = vst.msk [vmem:[#allocation0 + $0x200] ss:$8 sm:$0xf] %vm258_vm0, %v1987_v18   ;;  %316 = vst.msk [vmem:[#allocation0 + $0x200] ss:$8 sm:$0xf0] %vm258_vm0, %v1987_v18  }
   0xd   :  { %321 = vst.msk [vmem:[#allocation0 + $0x240] ss:$8 sm:$0xf] %vm258_vm0, %v1988_v19   ;;  %323 = vst.msk [vmem:[#allocation0 + $0x240] ss:$8 sm:$0xf0] %vm258_vm0, %v1988_v19  }
   0xe   :  { %328 = vst.msk [vmem:[#allocation0 + $0x280] ss:$8 sm:$0xf] %vm258_vm0, %v1983_v21   ;;  %330 = vst.msk [vmem:[#allocation0 + $0x280] ss:$8 sm:$0xf0] %vm258_vm0, %v1983_v21   ;;  %2037 = vrot.lane.b32.xlu0 %v2036_v28, %s2136_s0  ;;  %2042 = vrot.lane.b32.xlu1 %v2041_v29, %s2136_s0 }
   0xf   :  { %335 = vst.msk [vmem:[#allocation0 + $0x2c0] ss:$8 sm:$0xf] %vm258_vm0, %v1984_v22   ;;  %337 = vst.msk [vmem:[#allocation0 + $0x2c0] ss:$8 sm:$0xf0] %vm258_vm0, %v1984_v22  }
  0x10   :  { %342 = vst.msk [vmem:[#allocation0 + $0x300] ss:$8 sm:$0xf] %vm258_vm0, %v1979_v24   ;;  %344 = vst.msk [vmem:[#allocation0 + $0x300] ss:$8 sm:$0xf0] %vm258_vm0, %v1979_v24  }
  0x11   :  { %349 = vst.msk [vmem:[#allocation0 + $0x340] ss:$8 sm:$0xf] %vm258_vm0, %v1980_v25   ;;  %351 = vst.msk [vmem:[#allocation0 + $0x340] ss:$8 sm:$0xf0] %vm258_vm0, %v1980_v25  }
  0x12   :  { %356 = vst.msk [vmem:[#allocation0 + $0x380] ss:$8 sm:$0xf] %vm258_vm0, %v1975_v26   ;;  %358 = vst.msk [vmem:[#allocation0 + $0x380] ss:$8 sm:$0xf0] %vm258_vm0, %v1975_v26   ;;  %2047 = vrot.lane.b32.xlu0 %v2046_v30, %s2136_s0  ;;  %2052 = vrot.lane.b32.xlu1 %v2051_v31, %s2136_s0 }
  0x13   :  { %363 = vst.msk [vmem:[#allocation0 + $0x3c0] ss:$8 sm:$0xf] %vm258_vm0, %v1976_v27   ;;  %365 = vst.msk [vmem:[#allocation0 + $0x3c0] ss:$8 sm:$0xf0] %vm258_vm0, %v1976_v27  }
  0x16   :  { %2057 = vrot.lane.b32.xlu0 %v2176_v16, %s2137_s22  ;;  %2062 = vrot.lane.b32.xlu1 %v2021_v20, %s2137_s22 }
  0x1a   :  { %2067 = vrot.lane.b32.xlu0 %v2026_v17, %s2137_s22  ;;  %2072 = vrot.lane.b32.xlu1 %v2031_v23, %s2137_s22 }
  0x1e   :  { %2077 = vrot.lane.b32.xlu0 %v2036_v28, %s2137_s22  ;;  %2082 = vrot.lane.b32.xlu1 %v2041_v29, %s2137_s22 }
  0x22   :  { %2087 = vrot.lane.b32.xlu0 %v2046_v30, %s2137_s22  ;;  %2092 = vrot.lane.b32.xlu1 %v2051_v31, %s2137_s22 }
  0x26   :  { %2097 = vrot.lane.b32.xlu0 %v2176_v16, %s2138_s23  ;;  %2102 = vrot.lane.b32.xlu1 %v2021_v20, %s2138_s23 }
  0x2a   :  { %2107 = vrot.lane.b32.xlu0 %v2026_v17, %s2138_s23  ;;  %2112 = vrot.lane.b32.xlu1 %v2031_v23, %s2138_s23 }
  0x2e   :  { %2117 = vrot.lane.b32.xlu0 %v2036_v28, %s2138_s23  ;;  %2122 = vrot.lane.b32.xlu1 %v2041_v29, %s2138_s23 }
  0x32   :  { %2127 = vrot.lane.b32.xlu0 %v2046_v30, %s2138_s23  ;;  %2132 = vrot.lane.b32.xlu1 %v2051_v31, %s2138_s23 }
  0x78   :  { %v2018_v32 = vpop.permute.xlu0 %2017  ;;  %v2028_v33 = vpop.permute.xlu1 %2027 }
  0x79   :  { %v2020_v34 = vunpack.i.h.bf16 %v2018_v32  ;;  %v2019_v35 = vunpack.i.l.bf16 %v2018_v32  ;;  %v2030_v36 = vunpack.i.h.bf16 %v2028_v33  ;;  %v2029_v37 = vunpack.i.l.bf16 %v2028_v33 }
  0x7b   :  { %380 = vst.msk [vmem:[#allocation0 + $0x41] ss:$8 sm:$0xf] %vm258_vm0, %v2020_v34   ;;  %382 = vst.msk [vmem:[#allocation0 + $0x41] ss:$8 sm:$0xf0] %vm258_vm0, %v2020_v34  }
  0x7c   :  { %371 = vst.msk [vmem:[#allocation0 + $0x1] ss:$8 sm:$0xf] %vm258_vm0, %v2019_v35   ;;  %373 = vst.msk [vmem:[#allocation0 + $0x1] ss:$8 sm:$0xf0] %vm258_vm0, %v2019_v35   ;;  %v2023_v38 = vpop.permute.xlu0 %2022  ;;  %v2033_v39 = vpop.permute.xlu1 %2032 }
  0x7d   :  { %416 = vst.msk [vmem:[#allocation0 + $0x141] ss:$8 sm:$0xf] %vm258_vm0, %v2030_v36   ;;  %418 = vst.msk [vmem:[#allocation0 + $0x141] ss:$8 sm:$0xf0] %vm258_vm0, %v2030_v36   ;;  %v2025_v40 = vunpack.i.h.bf16 %v2023_v38  ;;  %v2024_v41 = vunpack.i.l.bf16 %v2023_v38  ;;  %v2035_v42 = vunpack.i.h.bf16 %v2033_v39  ;;  %v2034_v43 = vunpack.i.l.bf16 %v2033_v39 }
  0x7e   :  { %407 = vst.msk [vmem:[#allocation0 + $0x101] ss:$8 sm:$0xf] %vm258_vm0, %v2029_v37   ;;  %409 = vst.msk [vmem:[#allocation0 + $0x101] ss:$8 sm:$0xf0] %vm258_vm0, %v2029_v37  }
  0x7f   :  { %398 = vst.msk [vmem:[#allocation0 + $0xc1] ss:$8 sm:$0xf] %vm258_vm0, %v2025_v40   ;;  %400 = vst.msk [vmem:[#allocation0 + $0xc1] ss:$8 sm:$0xf0] %vm258_vm0, %v2025_v40  }
  0x80   :  { %389 = vst.msk [vmem:[#allocation0 + $0x81] ss:$8 sm:$0xf] %vm258_vm0, %v2024_v41   ;;  %391 = vst.msk [vmem:[#allocation0 + $0x81] ss:$8 sm:$0xf0] %vm258_vm0, %v2024_v41   ;;  %v2038_v44 = vpop.permute.xlu0 %2037  ;;  %v2043_v45 = vpop.permute.xlu1 %2042 }
  0x81   :  { %434 = vst.msk [vmem:[#allocation0 + $0x1c1] ss:$8 sm:$0xf] %vm258_vm0, %v2035_v42   ;;  %436 = vst.msk [vmem:[#allocation0 + $0x1c1] ss:$8 sm:$0xf0] %vm258_vm0, %v2035_v42   ;;  %v2040_v46 = vunpack.i.h.bf16 %v2038_v44  ;;  %v2039_v47 = vunpack.i.l.bf16 %v2038_v44  ;;  %v2045_v48 = vunpack.i.h.bf16 %v2043_v45  ;;  %v2044_v49 = vunpack.i.l.bf16 %v2043_v45 }
  0x82   :  { %425 = vst.msk [vmem:[#allocation0 + $0x181] ss:$8 sm:$0xf] %vm258_vm0, %v2034_v43   ;;  %427 = vst.msk [vmem:[#allocation0 + $0x181] ss:$8 sm:$0xf0] %vm258_vm0, %v2034_v43  }
  0x83   :  { %452 = vst.msk [vmem:[#allocation0 + $0x241] ss:$8 sm:$0xf] %vm258_vm0, %v2040_v46   ;;  %454 = vst.msk [vmem:[#allocation0 + $0x241] ss:$8 sm:$0xf0] %vm258_vm0, %v2040_v46  }
  0x84   :  { %443 = vst.msk [vmem:[#allocation0 + $0x201] ss:$8 sm:$0xf] %vm258_vm0, %v2039_v47   ;;  %445 = vst.msk [vmem:[#allocation0 + $0x201] ss:$8 sm:$0xf0] %vm258_vm0, %v2039_v47   ;;  %v2048_v50 = vpop.permute.xlu0 %2047  ;;  %v2053_v51 = vpop.permute.xlu1 %2052 }
  0x85   :  { %470 = vst.msk [vmem:[#allocation0 + $0x2c1] ss:$8 sm:$0xf] %vm258_vm0, %v2045_v48   ;;  %472 = vst.msk [vmem:[#allocation0 + $0x2c1] ss:$8 sm:$0xf0] %vm258_vm0, %v2045_v48   ;;  %v2050_v52 = vunpack.i.h.bf16 %v2048_v50  ;;  %v2049_v53 = vunpack.i.l.bf16 %v2048_v50  ;;  %v2055_v54 = vunpack.i.h.bf16 %v2053_v51  ;;  %v2054_v55 = vunpack.i.l.bf16 %v2053_v51 }
  0x86   :  { %461 = vst.msk [vmem:[#allocation0 + $0x281] ss:$8 sm:$0xf] %vm258_vm0, %v2044_v49   ;;  %463 = vst.msk [vmem:[#allocation0 + $0x281] ss:$8 sm:$0xf0] %vm258_vm0, %v2044_v49  }
  0x87   :  { %488 = vst.msk [vmem:[#allocation0 + $0x341] ss:$8 sm:$0xf] %vm258_vm0, %v2050_v52   ;;  %490 = vst.msk [vmem:[#allocation0 + $0x341] ss:$8 sm:$0xf0] %vm258_vm0, %v2050_v52  }
  0x88   :  { %479 = vst.msk [vmem:[#allocation0 + $0x301] ss:$8 sm:$0xf] %vm258_vm0, %v2049_v53   ;;  %481 = vst.msk [vmem:[#allocation0 + $0x301] ss:$8 sm:$0xf0] %vm258_vm0, %v2049_v53   ;;  %v2058_v56 = vpop.permute.xlu0 %2057  ;;  %v2063_v57 = vpop.permute.xlu1 %2062 }
  0x89   :  { %506 = vst.msk [vmem:[#allocation0 + $0x3c1] ss:$8 sm:$0xf] %vm258_vm0, %v2055_v54   ;;  %508 = vst.msk [vmem:[#allocation0 + $0x3c1] ss:$8 sm:$0xf0] %vm258_vm0, %v2055_v54   ;;  %v2060_v58 = vunpack.i.h.bf16 %v2058_v56  ;;  %v2059_v59 = vunpack.i.l.bf16 %v2058_v56  ;;  %v2065_v60 = vunpack.i.h.bf16 %v2063_v57  ;;  %v2064_v61 = vunpack.i.l.bf16 %v2063_v57 }
  0x8a   :  { %497 = vst.msk [vmem:[#allocation0 + $0x381] ss:$8 sm:$0xf] %vm258_vm0, %v2054_v55   ;;  %499 = vst.msk [vmem:[#allocation0 + $0x381] ss:$8 sm:$0xf0] %vm258_vm0, %v2054_v55  }
  0x8b   :  { %523 = vst.msk [vmem:[#allocation0 + $0x42] ss:$8 sm:$0xf] %vm258_vm0, %v2060_v58   ;;  %525 = vst.msk [vmem:[#allocation0 + $0x42] ss:$8 sm:$0xf0] %vm258_vm0, %v2060_v58  }
  0x8c   :  { %514 = vst.msk [vmem:[#allocation0 + $0x2] ss:$8 sm:$0xf] %vm258_vm0, %v2059_v59   ;;  %516 = vst.msk [vmem:[#allocation0 + $0x2] ss:$8 sm:$0xf0] %vm258_vm0, %v2059_v59   ;;  %v2068_v62 = vpop.permute.xlu0 %2067  ;;  %v2073_v63 = vpop.permute.xlu1 %2072 }
  0x8d   :  { %541 = vst.msk [vmem:[#allocation0 + $0xc2] ss:$8 sm:$0xf] %vm258_vm0, %v2065_v60   ;;  %543 = vst.msk [vmem:[#allocation0 + $0xc2] ss:$8 sm:$0xf0] %vm258_vm0, %v2065_v60   ;;  %v2070_v0 = vunpack.i.h.bf16 %v2068_v62  ;;  %v2069_v1 = vunpack.i.l.bf16 %v2068_v62  ;;  %v2075_v2 = vunpack.i.h.bf16 %v2073_v63  ;;  %v2074_v3 = vunpack.i.l.bf16 %v2073_v63 }
  0x8e   :  { %532 = vst.msk [vmem:[#allocation0 + $0x82] ss:$8 sm:$0xf] %vm258_vm0, %v2064_v61   ;;  %534 = vst.msk [vmem:[#allocation0 + $0x82] ss:$8 sm:$0xf0] %vm258_vm0, %v2064_v61  }
  0x8f   :  { %559 = vst.msk [vmem:[#allocation0 + $0x142] ss:$8 sm:$0xf] %vm258_vm0, %v2070_v0   ;;  %561 = vst.msk [vmem:[#allocation0 + $0x142] ss:$8 sm:$0xf0] %vm258_vm0, %v2070_v0  }
  0x90   :  { %550 = vst.msk [vmem:[#allocation0 + $0x102] ss:$8 sm:$0xf] %vm258_vm0, %v2069_v1   ;;  %552 = vst.msk [vmem:[#allocation0 + $0x102] ss:$8 sm:$0xf0] %vm258_vm0, %v2069_v1   ;;  %v2078_v4 = vpop.permute.xlu0 %2077  ;;  %v2083_v5 = vpop.permute.xlu1 %2082 }
  0x91   :  { %577 = vst.msk [vmem:[#allocation0 + $0x1c2] ss:$8 sm:$0xf] %vm258_vm0, %v2075_v2   ;;  %579 = vst.msk [vmem:[#allocation0 + $0x1c2] ss:$8 sm:$0xf0] %vm258_vm0, %v2075_v2   ;;  %v2080_v6 = vunpack.i.h.bf16 %v2078_v4  ;;  %v2079_v7 = vunpack.i.l.bf16 %v2078_v4  ;;  %v2085_v8 = vunpack.i.h.bf16 %v2083_v5  ;;  %v2084_v9 = vunpack.i.l.bf16 %v2083_v5 }
  0x92   :  { %568 = vst.msk [vmem:[#allocation0 + $0x182] ss:$8 sm:$0xf] %vm258_vm0, %v2074_v3   ;;  %570 = vst.msk [vmem:[#allocation0 + $0x182] ss:$8 sm:$0xf0] %vm258_vm0, %v2074_v3  }
  0x93   :  { %595 = vst.msk [vmem:[#allocation0 + $0x242] ss:$8 sm:$0xf] %vm258_vm0, %v2080_v6   ;;  %597 = vst.msk [vmem:[#allocation0 + $0x242] ss:$8 sm:$0xf0] %vm258_vm0, %v2080_v6  }
  0x94   :  { %586 = vst.msk [vmem:[#allocation0 + $0x202] ss:$8 sm:$0xf] %vm258_vm0, %v2079_v7   ;;  %588 = vst.msk [vmem:[#allocation0 + $0x202] ss:$8 sm:$0xf0] %vm258_vm0, %v2079_v7   ;;  %v2088_v10 = vpop.permute.xlu0 %2087  ;;  %v2093_v11 = vpop.permute.xlu1 %2092 }
  0x95   :  { %613 = vst.msk [vmem:[#allocation0 + $0x2c2] ss:$8 sm:$0xf] %vm258_vm0, %v2085_v8   ;;  %615 = vst.msk [vmem:[#allocation0 + $0x2c2] ss:$8 sm:$0xf0] %vm258_vm0, %v2085_v8   ;;  %v2090_v12 = vunpack.i.h.bf16 %v2088_v10  ;;  %v2089_v13 = vunpack.i.l.bf16 %v2088_v10  ;;  %v2095_v14 = vunpack.i.h.bf16 %v2093_v11  ;;  %v2094_v15 = vunpack.i.l.bf16 %v2093_v11 }
  0x96   :  { %604 = vst.msk [vmem:[#allocation0 + $0x282] ss:$8 sm:$0xf] %vm258_vm0, %v2084_v9   ;;  %606 = vst.msk [vmem:[#allocation0 + $0x282] ss:$8 sm:$0xf0] %vm258_vm0, %v2084_v9  }
  0x97   :  { %631 = vst.msk [vmem:[#allocation0 + $0x342] ss:$8 sm:$0xf] %vm258_vm0, %v2090_v12   ;;  %633 = vst.msk [vmem:[#allocation0 + $0x342] ss:$8 sm:$0xf0] %vm258_vm0, %v2090_v12  }
  0x98   :  { %622 = vst.msk [vmem:[#allocation0 + $0x302] ss:$8 sm:$0xf] %vm258_vm0, %v2089_v13   ;;  %624 = vst.msk [vmem:[#allocation0 + $0x302] ss:$8 sm:$0xf0] %vm258_vm0, %v2089_v13   ;;  %v2098_v16 = vpop.permute.xlu0 %2097  ;;  %v2103_v17 = vpop.permute.xlu1 %2102 }
  0x99   :  { %649 = vst.msk [vmem:[#allocation0 + $0x3c2] ss:$8 sm:$0xf] %vm258_vm0, %v2095_v14   ;;  %651 = vst.msk [vmem:[#allocation0 + $0x3c2] ss:$8 sm:$0xf0] %vm258_vm0, %v2095_v14   ;;  %v2100_v18 = vunpack.i.h.bf16 %v2098_v16  ;;  %v2099_v19 = vunpack.i.l.bf16 %v2098_v16  ;;  %v2105_v20 = vunpack.i.h.bf16 %v2103_v17  ;;  %v2104_v21 = vunpack.i.l.bf16 %v2103_v17 }
  0x9a   :  { %640 = vst.msk [vmem:[#allocation0 + $0x382] ss:$8 sm:$0xf] %vm258_vm0, %v2094_v15   ;;  %642 = vst.msk [vmem:[#allocation0 + $0x382] ss:$8 sm:$0xf0] %vm258_vm0, %v2094_v15  }
  0x9b   :  { %666 = vst.msk [vmem:[#allocation0 + $0x43] ss:$8 sm:$0xf] %vm258_vm0, %v2100_v18   ;;  %668 = vst.msk [vmem:[#allocation0 + $0x43] ss:$8 sm:$0xf0] %vm258_vm0, %v2100_v18  }
  0x9c   :  { %657 = vst.msk [vmem:[#allocation0 + $0x3] ss:$8 sm:$0xf] %vm258_vm0, %v2099_v19   ;;  %659 = vst.msk [vmem:[#allocation0 + $0x3] ss:$8 sm:$0xf0] %vm258_vm0, %v2099_v19   ;;  %v2108_v22 = vpop.permute.xlu0 %2107  ;;  %v2113_v23 = vpop.permute.xlu1 %2112 }
  0x9d   :  { %684 = vst.msk [vmem:[#allocation0 + $0xc3] ss:$8 sm:$0xf] %vm258_vm0, %v2105_v20   ;;  %686 = vst.msk [vmem:[#allocation0 + $0xc3] ss:$8 sm:$0xf0] %vm258_vm0, %v2105_v20   ;;  %v2110_v24 = vunpack.i.h.bf16 %v2108_v22  ;;  %v2109_v25 = vunpack.i.l.bf16 %v2108_v22  ;;  %v2115_v26 = vunpack.i.h.bf16 %v2113_v23  ;;  %v2114_v27 = vunpack.i.l.bf16 %v2113_v23 }
  0x9e   :  { %675 = vst.msk [vmem:[#allocation0 + $0x83] ss:$8 sm:$0xf] %vm258_vm0, %v2104_v21   ;;  %677 = vst.msk [vmem:[#allocation0 + $0x83] ss:$8 sm:$0xf0] %vm258_vm0, %v2104_v21  }
  0x9f   :  { %702 = vst.msk [vmem:[#allocation0 + $0x143] ss:$8 sm:$0xf] %vm258_vm0, %v2110_v24   ;;  %704 = vst.msk [vmem:[#allocation0 + $0x143] ss:$8 sm:$0xf0] %vm258_vm0, %v2110_v24  }
  0xa0   :  { %693 = vst.msk [vmem:[#allocation0 + $0x103] ss:$8 sm:$0xf] %vm258_vm0, %v2109_v25   ;;  %695 = vst.msk [vmem:[#allocation0 + $0x103] ss:$8 sm:$0xf0] %vm258_vm0, %v2109_v25   ;;  %v2118_v28 = vpop.permute.xlu0 %2117  ;;  %v2123_v29 = vpop.permute.xlu1 %2122 }
  0xa1   :  { %720 = vst.msk [vmem:[#allocation0 + $0x1c3] ss:$8 sm:$0xf] %vm258_vm0, %v2115_v26   ;;  %722 = vst.msk [vmem:[#allocation0 + $0x1c3] ss:$8 sm:$0xf0] %vm258_vm0, %v2115_v26   ;;  %v2120_v30 = vunpack.i.h.bf16 %v2118_v28  ;;  %v2119_v31 = vunpack.i.l.bf16 %v2118_v28  ;;  %v2125_v32 = vunpack.i.h.bf16 %v2123_v29  ;;  %v2124_v33 = vunpack.i.l.bf16 %v2123_v29 }
  0xa2   :  { %711 = vst.msk [vmem:[#allocation0 + $0x183] ss:$8 sm:$0xf] %vm258_vm0, %v2114_v27   ;;  %713 = vst.msk [vmem:[#allocation0 + $0x183] ss:$8 sm:$0xf0] %vm258_vm0, %v2114_v27  }
  0xa3   :  { %v799_v34 = vld [vmem:[#allocation0] sm:$0xf]  ;;  %v804_v35 = vld [vmem:[#allocation0 + $0x8] sm:$0xf]  ;;  %v810_v36 = vld [vmem:[#allocation0 + $0x10] sm:$0xf] }
  0xa4   :  { %v817_v37 = vld [vmem:[#allocation0 + $0x18] sm:$0xf]  ;;  %v824_v38 = vld [vmem:[#allocation0 + $0x20] sm:$0xf]  ;;  %v831_v39 = vld [vmem:[#allocation0 + $0x28] sm:$0xf]  ;;  %v2128_v50 = vpop.permute.xlu0 %2127  ;;  %v2313_v51 = vpop.permute.xlu1 %2132 }
  0xa5   :  { %v2139_v40 = vmov 0.0   ;;  %738 = vst.msk [vmem:[#allocation0 + $0x243] ss:$8 sm:$0xf] %vm258_vm0, %v2120_v30   ;;  %v838_v44 = vld [vmem:[#allocation0 + $0x30] sm:$0xf]  ;;  %v2130_v58 = vunpack.i.h.bf16 %v2128_v50  ;;  %v2129_v1 = vunpack.i.l.bf16 %v2128_v50  ;;  %v2135_v8 = vunpack.i.h.bf16 %v2313_v51 }
  0xa6   :  { %v800_v41 = vpack.c.bf16 %v2139_v40, %v799_v34  ;;  %v805_v42 = vpack.c.bf16 %v2139_v40, %v804_v35  ;;  %v811_v43 = vpack.c.bf16 %v2139_v40, %v810_v36  ;;  %740 = vst.msk [vmem:[#allocation0 + $0x243] ss:$8 sm:$0xf0] %vm258_vm0, %v2120_v30   ;;  %729 = vst.msk [vmem:[#allocation0 + $0x203] ss:$8 sm:$0xf] %vm258_vm0, %v2119_v31   ;;  %v2134_v15 = vunpack.i.l.bf16 %v2313_v51 }
  0xa7   :  { %731 = vst.msk [vmem:[#allocation0 + $0x203] ss:$8 sm:$0xf0] %vm258_vm0, %v2119_v31   ;;  %756 = vst.msk [vmem:[#allocation0 + $0x2c3] ss:$8 sm:$0xf] %vm258_vm0, %v2125_v32   ;;  %v818_v47 = vpack.c.bf16 %v2139_v40, %v817_v37  ;;  %v825_v48 = vpack.c.bf16 %v2139_v40, %v824_v38  ;;  %v832_v49 = vpack.c.bf16 %v2139_v40, %v831_v39 }
  0xa8   :  { %758 = vst.msk [vmem:[#allocation0 + $0x2c3] ss:$8 sm:$0xf0] %vm258_vm0, %v2125_v32   ;;  %747 = vst.msk [vmem:[#allocation0 + $0x283] ss:$8 sm:$0xf] %vm258_vm0, %v2124_v33   ;;  %v839_v55 = vpack.c.bf16 %v2139_v40, %v838_v44 }
  0xa9   :  { %749 = vst.msk [vmem:[#allocation0 + $0x283] ss:$8 sm:$0xf0] %vm258_vm0, %v2124_v33   ;;  %v845_v45 = vld [vmem:[#allocation0 + $0x38] sm:$0xf]  ;;  %802 = vst [vmem:[%s2832_s1] sm:$0x3] %v800_v41 }
  0xaa   :  { %v852_v46 = vld [vmem:[#allocation0 + $0x40] sm:$0xf]  ;;  %v859_v52 = vld [vmem:[#allocation0 + $0x48] sm:$0xf]  ;;  %v866_v53 = vld [vmem:[#allocation0 + $0x50] sm:$0xf]  ;;  %v846_v56 = vpack.c.bf16 %v2139_v40, %v845_v45 }
  0xab   :  { %v873_v54 = vld [vmem:[#allocation0 + $0x58] sm:$0xf]  ;;  %v853_v57 = vpack.c.bf16 %v2139_v40, %v852_v46  ;;  %1846 = vst [vmem:[%s2832_s1 + $0x2] sm:$0x3] %v805_v42  ;;  %1847 = vst [vmem:[%s2832_s1 + $0x4] sm:$0x3] %v811_v43  ;;  %v860_v62 = vpack.c.bf16 %v2139_v40, %v859_v52  ;;  %v867_v63 = vpack.c.bf16 %v2139_v40, %v866_v53 }
  0xac   :  { %v880_v59 = vld [vmem:[#allocation0 + $0x60] sm:$0xf]  ;;  %v887_v60 = vld [vmem:[#allocation0 + $0x68] sm:$0xf]  ;;  %v894_v61 = vld [vmem:[#allocation0 + $0x70] sm:$0xf]  ;;  %v874_v0 = vpack.c.bf16 %v2139_v40, %v873_v54 }
  0xad   :  { %1848 = vst [vmem:[%s2832_s1 + $0x6] sm:$0x3] %v818_v47  ;;  %1849 = vst [vmem:[%s2832_s1 + $0x8] sm:$0x3] %v825_v48  ;;  %v901_v2 = vld [vmem:[#allocation0 + $0x78] sm:$0xf]  ;;  %v881_v5 = vpack.c.bf16 %v2139_v40, %v880_v59  ;;  %v888_v6 = vpack.c.bf16 %v2139_v40, %v887_v60  ;;  %v895_v7 = vpack.c.bf16 %v2139_v40, %v894_v61 }
  0xae   :  { %1850 = vst [vmem:[%s2832_s1 + $0xa] sm:$0x3] %v832_v49  ;;  %v908_v3 = vld [vmem:[#allocation0 + $0x80] sm:$0xf]  ;;  %v915_v4 = vld [vmem:[#allocation0 + $0x88] sm:$0xf]  ;;  %v902_v12 = vpack.c.bf16 %v2139_v40, %v901_v2 }
  0xaf   :  { %1851 = vst [vmem:[%s2832_s1 + $0xc] sm:$0x3] %v839_v55  ;;  %1852 = vst [vmem:[%s2832_s1 + $0xe] sm:$0x3] %v846_v56  ;;  %v922_v9 = vld [vmem:[#allocation0 + $0x90] sm:$0xf]  ;;  %v909_v13 = vpack.c.bf16 %v2139_v40, %v908_v3  ;;  %v916_v14 = vpack.c.bf16 %v2139_v40, %v915_v4 }
  0xb0   :  { %1853 = vst [vmem:[%s2832_s1 + $0x10] sm:$0x3] %v853_v57  ;;  %774 = vst.msk [vmem:[#allocation0 + $0x343] ss:$8 sm:$0xf] %vm258_vm0, %v2130_v58   ;;  %v923_v19 = vpack.c.bf16 %v2139_v40, %v922_v9 }
  0xb1   :  { %776 = vst.msk [vmem:[#allocation0 + $0x343] ss:$8 sm:$0xf0] %vm258_vm0, %v2130_v58   ;;  %v929_v10 = vld [vmem:[#allocation0 + $0x98] sm:$0xf] }
  0xb2   :  { %v936_v11 = vld [vmem:[#allocation0 + $0xa0] sm:$0xf]  ;;  %1854 = vst [vmem:[%s2832_s1 + $0x12] sm:$0x3] %v860_v62  ;;  %1855 = vst [vmem:[%s2832_s1 + $0x14] sm:$0x3] %v867_v63  ;;  %v930_v20 = vpack.c.bf16 %v2139_v40, %v929_v10 }
  0xb3   :  { %1856 = vst [vmem:[%s2832_s1 + $0x16] sm:$0x3] %v874_v0  ;;  %765 = vst.msk [vmem:[#allocation0 + $0x303] ss:$8 sm:$0xf] %vm258_vm0, %v2129_v1   ;;  %v937_v21 = vpack.c.bf16 %v2139_v40, %v936_v11 }
  0xb4   :  { %767 = vst.msk [vmem:[#allocation0 + $0x303] ss:$8 sm:$0xf0] %vm258_vm0, %v2129_v1   ;;  %v943_v16 = vld [vmem:[#allocation0 + $0xa8] sm:$0xf] }
  0xb5   :  { %v950_v17 = vld [vmem:[#allocation0 + $0xb0] sm:$0xf]  ;;  %v957_v18 = vld [vmem:[#allocation0 + $0xb8] sm:$0xf]  ;;  %1857 = vst [vmem:[%s2832_s1 + $0x18] sm:$0x3] %v881_v5  ;;  %v944_v25 = vpack.c.bf16 %v2139_v40, %v943_v16 }
  0xb6   :  { %1858 = vst [vmem:[%s2832_s1 + $0x1a] sm:$0x3] %v888_v6  ;;  %1859 = vst [vmem:[%s2832_s1 + $0x1c] sm:$0x3] %v895_v7  ;;  %v964_v22 = vld [vmem:[#allocation0 + $0xc0] sm:$0xf]  ;;  %v951_v26 = vpack.c.bf16 %v2139_v40, %v950_v17  ;;  %v958_v27 = vpack.c.bf16 %v2139_v40, %v957_v18 }
  0xb7   :  { %792 = vst.msk [vmem:[#allocation0 + $0x3c3] ss:$8 sm:$0xf] %vm258_vm0, %v2135_v8   ;;  %794 = vst.msk [vmem:[#allocation0 + $0x3c3] ss:$8 sm:$0xf0] %vm258_vm0, %v2135_v8   ;;  %v965_v31 = vpack.c.bf16 %v2139_v40, %v964_v22 }
  0xb8   :  { %v971_v23 = vld [vmem:[#allocation0 + $0xc8] sm:$0xf]  ;;  %v978_v24 = vld [vmem:[#allocation0 + $0xd0] sm:$0xf]  ;;  %1860 = vst [vmem:[%s2832_s1 + $0x1e] sm:$0x3] %v902_v12 }
  0xb9   :  { %1861 = vst [vmem:[%s2832_s1 + $0x20] sm:$0x3] %v909_v13  ;;  %1862 = vst [vmem:[%s2832_s1 + $0x22] sm:$0x3] %v916_v14  ;;  %v985_v28 = vld [vmem:[#allocation0 + $0xd8] sm:$0xf]  ;;  %v972_v32 = vpack.c.bf16 %v2139_v40, %v971_v23  ;;  %v979_v33 = vpack.c.bf16 %v2139_v40, %v978_v24 }
  0xba   :  { %783 = vst.msk [vmem:[#allocation0 + $0x383] ss:$8 sm:$0xf] %vm258_vm0, %v2134_v15   ;;  %785 = vst.msk [vmem:[#allocation0 + $0x383] ss:$8 sm:$0xf0] %vm258_vm0, %v2134_v15   ;;  %v986_v37 = vpack.c.bf16 %v2139_v40, %v985_v28 }
  0xbb   :  { %v992_v29 = vld [vmem:[#allocation0 + $0xe0] sm:$0xf]  ;;  %v999_v30 = vld [vmem:[#allocation0 + $0xe8] sm:$0xf]  ;;  %1863 = vst [vmem:[%s2832_s1 + $0x24] sm:$0x3] %v923_v19 }
  0xbc   :  { %1864 = vst [vmem:[%s2832_s1 + $0x26] sm:$0x3] %v930_v20  ;;  %1865 = vst [vmem:[%s2832_s1 + $0x28] sm:$0x3] %v937_v21  ;;  %v1006_v34 = vld [vmem:[#allocation0 + $0xf0] sm:$0xf]  ;;  %v993_v38 = vpack.c.bf16 %v2139_v40, %v992_v29  ;;  %v1000_v39 = vpack.c.bf16 %v2139_v40, %v999_v30 }
  0xbd   :  { %v1013_v35 = vld [vmem:[#allocation0 + $0xf8] sm:$0xf]  ;;  %v1020_v36 = vld [vmem:[#allocation0 + $0x100] sm:$0xf]  ;;  %1866 = vst [vmem:[%s2832_s1 + $0x2a] sm:$0x3] %v944_v25  ;;  %v1007_v44 = vpack.c.bf16 %v2139_v40, %v1006_v34 }
  0xbe   :  { %1867 = vst [vmem:[%s2832_s1 + $0x2c] sm:$0x3] %v951_v26  ;;  %1868 = vst [vmem:[%s2832_s1 + $0x2e] sm:$0x3] %v958_v27  ;;  %v1027_v41 = vld [vmem:[#allocation0 + $0x108] sm:$0xf]  ;;  %v1014_v45 = vpack.c.bf16 %v2139_v40, %v1013_v35  ;;  %v1021_v46 = vpack.c.bf16 %v2139_v40, %v1020_v36 }
  0xbf   :  { %v1034_v42 = vld [vmem:[#allocation0 + $0x110] sm:$0xf]  ;;  %v1041_v43 = vld [vmem:[#allocation0 + $0x118] sm:$0xf]  ;;  %1869 = vst [vmem:[%s2832_s1 + $0x30] sm:$0x3] %v965_v31  ;;  %v1028_v50 = vpack.c.bf16 %v2139_v40, %v1027_v41 }
  0xc0   :  { %1870 = vst [vmem:[%s2832_s1 + $0x32] sm:$0x3] %v972_v32  ;;  %1871 = vst [vmem:[%s2832_s1 + $0x34] sm:$0x3] %v979_v33  ;;  %v1048_v47 = vld [vmem:[#allocation0 + $0x120] sm:$0xf]  ;;  %v1035_v51 = vpack.c.bf16 %v2139_v40, %v1034_v42  ;;  %v1042_v52 = vpack.c.bf16 %v2139_v40, %v1041_v43 }
  0xc1   :  { %v1055_v48 = vld [vmem:[#allocation0 + $0x128] sm:$0xf]  ;;  %v1062_v49 = vld [vmem:[#allocation0 + $0x130] sm:$0xf]  ;;  %1872 = vst [vmem:[%s2832_s1 + $0x36] sm:$0x3] %v986_v37  ;;  %v1049_v56 = vpack.c.bf16 %v2139_v40, %v1048_v47 }
  0xc2   :  { %1873 = vst [vmem:[%s2832_s1 + $0x38] sm:$0x3] %v993_v38  ;;  %1874 = vst [vmem:[%s2832_s1 + $0x3a] sm:$0x3] %v1000_v39  ;;  %v1069_v53 = vld [vmem:[#allocation0 + $0x138] sm:$0xf]  ;;  %v1056_v57 = vpack.c.bf16 %v2139_v40, %v1055_v48  ;;  %v1063_v58 = vpack.c.bf16 %v2139_v40, %v1062_v49 }
  0xc3   :  { %v1076_v54 = vld [vmem:[#allocation0 + $0x140] sm:$0xf]  ;;  %v1083_v55 = vld [vmem:[#allocation0 + $0x148] sm:$0xf]  ;;  %1875 = vst [vmem:[%s2832_s1 + $0x3c] sm:$0x3] %v1007_v44  ;;  %v1070_v62 = vpack.c.bf16 %v2139_v40, %v1069_v53 }
  0xc4   :  { %1876 = vst [vmem:[%s2832_s1 + $0x3e] sm:$0x3] %v1014_v45  ;;  %1877 = vst [vmem:[%s2832_s1 + $0x40] sm:$0x3] %v1021_v46  ;;  %v1090_v59 = vld [vmem:[#allocation0 + $0x150] sm:$0xf]  ;;  %v1077_v63 = vpack.c.bf16 %v2139_v40, %v1076_v54  ;;  %v1084_v0 = vpack.c.bf16 %v2139_v40, %v1083_v55 }
  0xc5   :  { %v1097_v60 = vld [vmem:[#allocation0 + $0x158] sm:$0xf]  ;;  %v1104_v61 = vld [vmem:[#allocation0 + $0x160] sm:$0xf]  ;;  %1878 = vst [vmem:[%s2832_s1 + $0x42] sm:$0x3] %v1028_v50  ;;  %v1091_v4 = vpack.c.bf16 %v2139_v40, %v1090_v59 }
  0xc6   :  { %1879 = vst [vmem:[%s2832_s1 + $0x44] sm:$0x3] %v1035_v51  ;;  %1880 = vst [vmem:[%s2832_s1 + $0x46] sm:$0x3] %v1042_v52  ;;  %v1111_v1 = vld [vmem:[#allocation0 + $0x168] sm:$0xf]  ;;  %v1098_v5 = vpack.c.bf16 %v2139_v40, %v1097_v60  ;;  %v1105_v6 = vpack.c.bf16 %v2139_v40, %v1104_v61 }
  0xc7   :  { %v1118_v2 = vld [vmem:[#allocation0 + $0x170] sm:$0xf]  ;;  %v1125_v3 = vld [vmem:[#allocation0 + $0x178] sm:$0xf]  ;;  %1881 = vst [vmem:[%s2832_s1 + $0x48] sm:$0x3] %v1049_v56  ;;  %v1112_v10 = vpack.c.bf16 %v2139_v40, %v1111_v1 }
  0xc8   :  { %1882 = vst [vmem:[%s2832_s1 + $0x4a] sm:$0x3] %v1056_v57  ;;  %1883 = vst [vmem:[%s2832_s1 + $0x4c] sm:$0x3] %v1063_v58  ;;  %v1160_v7 = vld [vmem:[#allocation0 + $0x1a0] sm:$0xf]  ;;  %v1119_v11 = vpack.c.bf16 %v2139_v40, %v1118_v2  ;;  %v1126_v12 = vpack.c.bf16 %v2139_v40, %v1125_v3 }
  0xc9   :  { %v1167_v8 = vld [vmem:[#allocation0 + $0x1a8] sm:$0xf]  ;;  %v1174_v9 = vld [vmem:[#allocation0 + $0x1b0] sm:$0xf]  ;;  %1884 = vst [vmem:[%s2832_s1 + $0x4e] sm:$0x3] %v1070_v62  ;;  %v1161_v13 = vpack.c.bf16 %v2139_v40, %v1160_v7 }
  0xca   :  { %1885 = vst [vmem:[%s2832_s1 + $0x50] sm:$0x3] %v1077_v63  ;;  %1886 = vst [vmem:[%s2832_s1 + $0x52] sm:$0x3] %v1084_v0  ;;  %v1168_v14 = vpack.c.bf16 %v2139_v40, %v1167_v8  ;;  %v1175_v15 = vpack.c.bf16 %v2139_v40, %v1174_v9  ;;  %v1181_v16 = vld [vmem:[#allocation0 + $0x1b8] sm:$0xf] }
  0xcb   :  { %v1132_v17 = vld [vmem:[#allocation0 + $0x180] sm:$0xf]  ;;  %v1139_v18 = vld [vmem:[#allocation0 + $0x188] sm:$0xf]  ;;  %1887 = vst [vmem:[%s2832_s1 + $0x54] sm:$0x3] %v1091_v4  ;;  %v1182_v19 = vpack.c.bf16 %v2139_v40, %v1181_v16 }
  0xcc   :  { %1888 = vst [vmem:[%s2832_s1 + $0x56] sm:$0x3] %v1098_v5  ;;  %1889 = vst [vmem:[%s2832_s1 + $0x58] sm:$0x3] %v1105_v6  ;;  %v1146_v20 = vld [vmem:[#allocation0 + $0x190] sm:$0xf]  ;;  %v1133_v23 = vpack.c.bf16 %v2139_v40, %v1132_v17  ;;  %v1140_v24 = vpack.c.bf16 %v2139_v40, %v1139_v18 }
  0xcd   :  { %v1153_v21 = vld [vmem:[#allocation0 + $0x198] sm:$0xf]  ;;  %v1188_v22 = vld [vmem:[#allocation0 + $0x1c0] sm:$0xf]  ;;  %1890 = vst [vmem:[%s2832_s1 + $0x5a] sm:$0x3] %v1112_v10  ;;  %v1147_v28 = vpack.c.bf16 %v2139_v40, %v1146_v20 }
  0xce   :  { %1891 = vst [vmem:[%s2832_s1 + $0x5c] sm:$0x3] %v1119_v11  ;;  %1892 = vst [vmem:[%s2832_s1 + $0x5e] sm:$0x3] %v1126_v12  ;;  %v1195_v25 = vld [vmem:[#allocation0 + $0x1c8] sm:$0xf]  ;;  %v1154_v29 = vpack.c.bf16 %v2139_v40, %v1153_v21  ;;  %v1189_v30 = vpack.c.bf16 %v2139_v40, %v1188_v22 }
  0xcf   :  { %1897 = vst [vmem:[%s2832_s1 + $0x68] sm:$0x3] %v1161_v13  ;;  %1898 = vst [vmem:[%s2832_s1 + $0x6a] sm:$0x3] %v1168_v14  ;;  %v1202_v26 = vld [vmem:[#allocation0 + $0x1d0] sm:$0xf]  ;;  %v1196_v34 = vpack.c.bf16 %v2139_v40, %v1195_v25 }
  0xd0   :  { %1899 = vst [vmem:[%s2832_s1 + $0x6c] sm:$0x3] %v1175_v15  ;;  %v1209_v27 = vld [vmem:[#allocation0 + $0x1d8] sm:$0xf]  ;;  %1900 = vst [vmem:[%s2832_s1 + $0x6e] sm:$0x3] %v1182_v19  ;;  %v1203_v35 = vpack.c.bf16 %v2139_v40, %v1202_v26 }
  0xd1   :  { %v1216_v31 = vld [vmem:[#allocation0 + $0x1e0] sm:$0xf]  ;;  %v1223_v32 = vld [vmem:[#allocation0 + $0x1e8] sm:$0xf]  ;;  %v1230_v33 = vld [vmem:[#allocation0 + $0x1f0] sm:$0xf]  ;;  %v1210_v36 = vpack.c.bf16 %v2139_v40, %v1209_v27 }
  0xd2   :  { %1893 = vst [vmem:[%s2832_s1 + $0x60] sm:$0x3] %v1133_v23  ;;  %1894 = vst [vmem:[%s2832_s1 + $0x62] sm:$0x3] %v1140_v24  ;;  %v1237_v37 = vld [vmem:[#allocation0 + $0x1f8] sm:$0xf]  ;;  %v1217_v41 = vpack.c.bf16 %v2139_v40, %v1216_v31  ;;  %v1224_v42 = vpack.c.bf16 %v2139_v40, %v1223_v32  ;;  %v1231_v43 = vpack.c.bf16 %v2139_v40, %v1230_v33 }
  0xd3   :  { %v1244_v38 = vld [vmem:[#allocation0 + $0x200] sm:$0xf]  ;;  %v1251_v39 = vld [vmem:[#allocation0 + $0x208] sm:$0xf]  ;;  %1895 = vst [vmem:[%s2832_s1 + $0x64] sm:$0x3] %v1147_v28  ;;  %v1238_v49 = vpack.c.bf16 %v2139_v40, %v1237_v37 }
  0xd4   :  { %1896 = vst [vmem:[%s2832_s1 + $0x66] sm:$0x3] %v1154_v29  ;;  %1901 = vst [vmem:[%s2832_s1 + $0x70] sm:$0x3] %v1189_v30  ;;  %v1245_v44 = vpack.c.bf16 %v2139_v40, %v1244_v38  ;;  %v1252_v45 = vpack.c.bf16 %v2139_v40, %v1251_v39  ;;  %v1258_v46 = vld [vmem:[#allocation0 + $0x210] sm:$0xf] }
  0xd5   :  { %v1265_v47 = vld [vmem:[#allocation0 + $0x218] sm:$0xf]  ;;  %v1272_v48 = vld [vmem:[#allocation0 + $0x220] sm:$0xf]  ;;  %1902 = vst [vmem:[%s2832_s1 + $0x72] sm:$0x3] %v1196_v34  ;;  %v1259_v50 = vpack.c.bf16 %v2139_v40, %v1258_v46 }
  0xd6   :  { %1903 = vst [vmem:[%s2832_s1 + $0x74] sm:$0x3] %v1203_v35  ;;  %1904 = vst [vmem:[%s2832_s1 + $0x76] sm:$0x3] %v1210_v36  ;;  %v1266_v51 = vpack.c.bf16 %v2139_v40, %v1265_v47  ;;  %v1273_v52 = vpack.c.bf16 %v2139_v40, %v1272_v48  ;;  %v1279_v53 = vld [vmem:[#allocation0 + $0x228] sm:$0xf] }
  0xd7   :  { %v1286_v54 = vld [vmem:[#allocation0 + $0x230] sm:$0xf]  ;;  %v1293_v55 = vld [vmem:[#allocation0 + $0x238] sm:$0xf]  ;;  %1905 = vst [vmem:[%s2832_s1 + $0x78] sm:$0x3] %v1217_v41  ;;  %v1280_v56 = vpack.c.bf16 %v2139_v40, %v1279_v53 }
  0xd8   :  { %1906 = vst [vmem:[%s2832_s1 + $0x7a] sm:$0x3] %v1224_v42  ;;  %1907 = vst [vmem:[%s2832_s1 + $0x7c] sm:$0x3] %v1231_v43  ;;  %v1287_v57 = vpack.c.bf16 %v2139_v40, %v1286_v54  ;;  %v1294_v58 = vpack.c.bf16 %v2139_v40, %v1293_v55  ;;  %v1300_v59 = vld [vmem:[#allocation0 + $0x240] sm:$0xf] }
  0xd9   :  { %1909 = vst [vmem:[%s2832_s1 + $0x80] sm:$0x3] %v1245_v44  ;;  %1910 = vst [vmem:[%s2832_s1 + $0x82] sm:$0x3] %v1252_v45  ;;  %v1307_v60 = vld [vmem:[#allocation0 + $0x248] sm:$0xf]  ;;  %v1301_v1 = vpack.c.bf16 %v2139_v40, %v1300_v59 }
  0xda   :  { %v1314_v61 = vld [vmem:[#allocation0 + $0x250] sm:$0xf]  ;;  %1908 = vst [vmem:[%s2832_s1 + $0x7e] sm:$0x3] %v1238_v49  ;;  %1911 = vst [vmem:[%s2832_s1 + $0x84] sm:$0x3] %v1259_v50  ;;  %v1308_v2 = vpack.c.bf16 %v2139_v40, %v1307_v60 }
  0xdb   :  { %1912 = vst [vmem:[%s2832_s1 + $0x86] sm:$0x3] %v1266_v51  ;;  %1913 = vst [vmem:[%s2832_s1 + $0x88] sm:$0x3] %v1273_v52  ;;  %v1321_v62 = vld [vmem:[#allocation0 + $0x258] sm:$0xf]  ;;  %v1315_v3 = vpack.c.bf16 %v2139_v40, %v1314_v61 }
  0xdc   :  { %v1328_v63 = vld [vmem:[#allocation0 + $0x260] sm:$0xf]  ;;  %v1335_v0 = vld [vmem:[#allocation0 + $0x268] sm:$0xf]  ;;  %1914 = vst [vmem:[%s2832_s1 + $0x8a] sm:$0x3] %v1280_v56  ;;  %v1322_v7 = vpack.c.bf16 %v2139_v40, %v1321_v62 }
  0xdd   :  { %1915 = vst [vmem:[%s2832_s1 + $0x8c] sm:$0x3] %v1287_v57  ;;  %1916 = vst [vmem:[%s2832_s1 + $0x8e] sm:$0x3] %v1294_v58  ;;  %v1342_v4 = vld [vmem:[#allocation0 + $0x270] sm:$0xf]  ;;  %v1329_v8 = vpack.c.bf16 %v2139_v40, %v1328_v63  ;;  %v1336_v9 = vpack.c.bf16 %v2139_v40, %v1335_v0 }
  0xde   :  { %v1349_v5 = vld [vmem:[#allocation0 + $0x278] sm:$0xf]  ;;  %v1356_v6 = vld [vmem:[#allocation0 + $0x280] sm:$0xf]  ;;  %v1363_v11 = vld [vmem:[#allocation0 + $0x288] sm:$0xf]  ;;  %v1343_v14 = vpack.c.bf16 %v2139_v40, %v1342_v4 }
  0xdf   :  { %v1357_v10 = vpack.c.bf16 %v2139_v40, %v1356_v6  ;;  %v1370_v12 = vld [vmem:[#allocation0 + $0x290] sm:$0xf]  ;;  %v1377_v13 = vld [vmem:[#allocation0 + $0x298] sm:$0xf]  ;;  %v1350_v15 = vpack.c.bf16 %v2139_v40, %v1349_v5  ;;  %1917 = vst [vmem:[%s2832_s1 + $0x90] sm:$0x3] %v1301_v1  ;;  %v1364_v16 = vpack.c.bf16 %v2139_v40, %v1363_v11 }
  0xe0   :  { %1918 = vst [vmem:[%s2832_s1 + $0x92] sm:$0x3] %v1308_v2  ;;  %1919 = vst [vmem:[%s2832_s1 + $0x94] sm:$0x3] %v1315_v3  ;;  %v1371_v17 = vpack.c.bf16 %v2139_v40, %v1370_v12  ;;  %v1378_v18 = vpack.c.bf16 %v2139_v40, %v1377_v13  ;;  %v1384_v19 = vld [vmem:[#allocation0 + $0x2a0] sm:$0xf] }
  0xe1   :  { %v1391_v20 = vld [vmem:[#allocation0 + $0x2a8] sm:$0xf]  ;;  %v1398_v21 = vld [vmem:[#allocation0 + $0x2b0] sm:$0xf]  ;;  %1920 = vst [vmem:[%s2832_s1 + $0x96] sm:$0x3] %v1322_v7  ;;  %v1385_v22 = vpack.c.bf16 %v2139_v40, %v1384_v19 }
  0xe2   :  { %1921 = vst [vmem:[%s2832_s1 + $0x98] sm:$0x3] %v1329_v8  ;;  %1922 = vst [vmem:[%s2832_s1 + $0x9a] sm:$0x3] %v1336_v9  ;;  %v1392_v23 = vpack.c.bf16 %v2139_v40, %v1391_v20  ;;  %v1399_v24 = vpack.c.bf16 %v2139_v40, %v1398_v21  ;;  %v1405_v25 = vld [vmem:[#allocation0 + $0x2b8] sm:$0xf] }
  0xe3   :  { %1925 = vst [vmem:[%s2832_s1 + $0xa0] sm:$0x3] %v1357_v10  ;;  %v1412_v26 = vld [vmem:[#allocation0 + $0x2c0] sm:$0xf]  ;;  %v1419_v27 = vld [vmem:[#allocation0 + $0x2c8] sm:$0xf]  ;;  %v1406_v28 = vpack.c.bf16 %v2139_v40, %v1405_v25 }
  0xe4   :  { %1923 = vst [vmem:[%s2832_s1 + $0x9c] sm:$0x3] %v1343_v14  ;;  %1924 = vst [vmem:[%s2832_s1 + $0x9e] sm:$0x3] %v1350_v15  ;;  %v1413_v29 = vpack.c.bf16 %v2139_v40, %v1412_v26  ;;  %v1420_v30 = vpack.c.bf16 %v2139_v40, %v1419_v27  ;;  %v1426_v31 = vld [vmem:[#allocation0 + $0x2d0] sm:$0xf] }
  0xe5   :  { %1926 = vst [vmem:[%s2832_s1 + $0xa2] sm:$0x3] %v1364_v16  ;;  %1927 = vst [vmem:[%s2832_s1 + $0xa4] sm:$0x3] %v1371_v17  ;;  %v1433_v32 = vld [vmem:[#allocation0 + $0x2d8] sm:$0xf]  ;;  %v1427_v34 = vpack.c.bf16 %v2139_v40, %v1426_v31 }
  0xe6   :  { %1928 = vst [vmem:[%s2832_s1 + $0xa6] sm:$0x3] %v1378_v18  ;;  %v1440_v33 = vld [vmem:[#allocation0 + $0x2e0] sm:$0xf]  ;;  %1929 = vst [vmem:[%s2832_s1 + $0xa8] sm:$0x3] %v1385_v22  ;;  %v1434_v35 = vpack.c.bf16 %v2139_v40, %v1433_v32 }
  0xe7   :  { %1930 = vst [vmem:[%s2832_s1 + $0xaa] sm:$0x3] %v1392_v23  ;;  %1931 = vst [vmem:[%s2832_s1 + $0xac] sm:$0x3] %v1399_v24  ;;  %v1441_v36 = vpack.c.bf16 %v2139_v40, %v1440_v33  ;;  %v1447_v37 = vld [vmem:[#allocation0 + $0x2e8] sm:$0xf] }
  0xe8   :  { %v1454_v38 = vld [vmem:[#allocation0 + $0x2f0] sm:$0xf]  ;;  %v1461_v39 = vld [vmem:[#allocation0 + $0x2f8] sm:$0xf]  ;;  %1932 = vst [vmem:[%s2832_s1 + $0xae] sm:$0x3] %v1406_v28  ;;  %v1448_v41 = vpack.c.bf16 %v2139_v40, %v1447_v37 }
  0xe9   :  { %1933 = vst [vmem:[%s2832_s1 + $0xb0] sm:$0x3] %v1413_v29  ;;  %1934 = vst [vmem:[%s2832_s1 + $0xb2] sm:$0x3] %v1420_v30  ;;  %v1455_v42 = vpack.c.bf16 %v2139_v40, %v1454_v38  ;;  %v1462_v43 = vpack.c.bf16 %v2139_v40, %v1461_v39  ;;  %v1468_v44 = vld [vmem:[#allocation0 + $0x300] sm:$0xf] }
  0xea   :  { %v1475_v45 = vld [vmem:[#allocation0 + $0x308] sm:$0xf]  ;;  %v1482_v46 = vld [vmem:[#allocation0 + $0x310] sm:$0xf]  ;;  %1935 = vst [vmem:[%s2832_s1 + $0xb4] sm:$0x3] %v1427_v34  ;;  %v1469_v47 = vpack.c.bf16 %v2139_v40, %v1468_v44 }
  0xeb   :  { %1936 = vst [vmem:[%s2832_s1 + $0xb6] sm:$0x3] %v1434_v35  ;;  %1937 = vst [vmem:[%s2832_s1 + $0xb8] sm:$0x3] %v1441_v36  ;;  %v1476_v48 = vpack.c.bf16 %v2139_v40, %v1475_v45  ;;  %v1483_v49 = vpack.c.bf16 %v2139_v40, %v1482_v46  ;;  %v1489_v50 = vld [vmem:[#allocation0 + $0x318] sm:$0xf] }
  0xec   :  { %v1496_v51 = vld [vmem:[#allocation0 + $0x320] sm:$0xf]  ;;  %v1503_v52 = vld [vmem:[#allocation0 + $0x328] sm:$0xf]  ;;  %1938 = vst [vmem:[%s2832_s1 + $0xba] sm:$0x3] %v1448_v41  ;;  %v1490_v53 = vpack.c.bf16 %v2139_v40, %v1489_v50 }
  0xed   :  { %1939 = vst [vmem:[%s2832_s1 + $0xbc] sm:$0x3] %v1455_v42  ;;  %1940 = vst [vmem:[%s2832_s1 + $0xbe] sm:$0x3] %v1462_v43  ;;  %v1497_v54 = vpack.c.bf16 %v2139_v40, %v1496_v51  ;;  %v1504_v55 = vpack.c.bf16 %v2139_v40, %v1503_v52  ;;  %v1510_v56 = vld [vmem:[#allocation0 + $0x330] sm:$0xf] }
  0xee   :  { %v1517_v57 = vld [vmem:[#allocation0 + $0x338] sm:$0xf]  ;;  %v1524_v58 = vld [vmem:[#allocation0 + $0x340] sm:$0xf]  ;;  %1941 = vst [vmem:[%s2832_s1 + $0xc0] sm:$0x3] %v1469_v47  ;;  %v1511_v59 = vpack.c.bf16 %v2139_v40, %v1510_v56 }
  0xef   :  { %1942 = vst [vmem:[%s2832_s1 + $0xc2] sm:$0x3] %v1476_v48  ;;  %1943 = vst [vmem:[%s2832_s1 + $0xc4] sm:$0x3] %v1483_v49  ;;  %v1518_v60 = vpack.c.bf16 %v2139_v40, %v1517_v57  ;;  %v1525_v61 = vpack.c.bf16 %v2139_v40, %v1524_v58  ;;  %v1531_v62 = vld [vmem:[#allocation0 + $0x348] sm:$0xf] }
  0xf0   :  { %v1538_v63 = vld [vmem:[#allocation0 + $0x350] sm:$0xf]  ;;  %v1545_v0 = vld [vmem:[#allocation0 + $0x358] sm:$0xf]  ;;  %1944 = vst [vmem:[%s2832_s1 + $0xc6] sm:$0x3] %v1490_v53  ;;  %v1532_v1 = vpack.c.bf16 %v2139_v40, %v1531_v62 }
  0xf1   :  { %1945 = vst [vmem:[%s2832_s1 + $0xc8] sm:$0x3] %v1497_v54  ;;  %1946 = vst [vmem:[%s2832_s1 + $0xca] sm:$0x3] %v1504_v55  ;;  %v1539_v2 = vpack.c.bf16 %v2139_v40, %v1538_v63  ;;  %v1546_v3 = vpack.c.bf16 %v2139_v40, %v1545_v0  ;;  %v1552_v4 = vld [vmem:[#allocation0 + $0x360] sm:$0xf] }
  0xf2   :  { %v1559_v5 = vld [vmem:[#allocation0 + $0x368] sm:$0xf]  ;;  %v1566_v6 = vld [vmem:[#allocation0 + $0x370] sm:$0xf]  ;;  %1947 = vst [vmem:[%s2832_s1 + $0xcc] sm:$0x3] %v1511_v59  ;;  %v1553_v7 = vpack.c.bf16 %v2139_v40, %v1552_v4 }
  0xf3   :  { %1948 = vst [vmem:[%s2832_s1 + $0xce] sm:$0x3] %v1518_v60  ;;  %1949 = vst [vmem:[%s2832_s1 + $0xd0] sm:$0x3] %v1525_v61  ;;  %v1560_v8 = vpack.c.bf16 %v2139_v40, %v1559_v5  ;;  %v1567_v9 = vpack.c.bf16 %v2139_v40, %v1566_v6  ;;  %v1573_v10 = vld [vmem:[#allocation0 + $0x378] sm:$0xf] }
  0xf4   :  { %v1580_v11 = vld [vmem:[#allocation0 + $0x380] sm:$0xf]  ;;  %v1587_v12 = vld [vmem:[#allocation0 + $0x388] sm:$0xf]  ;;  %1950 = vst [vmem:[%s2832_s1 + $0xd2] sm:$0x3] %v1532_v1  ;;  %v1574_v13 = vpack.c.bf16 %v2139_v40, %v1573_v10 }
  0xf5   :  { %1951 = vst [vmem:[%s2832_s1 + $0xd4] sm:$0x3] %v1539_v2  ;;  %1952 = vst [vmem:[%s2832_s1 + $0xd6] sm:$0x3] %v1546_v3  ;;  %v1581_v14 = vpack.c.bf16 %v2139_v40, %v1580_v11  ;;  %v1588_v15 = vpack.c.bf16 %v2139_v40, %v1587_v12  ;;  %v1594_v16 = vld [vmem:[#allocation0 + $0x390] sm:$0xf] }
  0xf6   :  { %v1601_v17 = vld [vmem:[#allocation0 + $0x398] sm:$0xf]  ;;  %v1608_v18 = vld [vmem:[#allocation0 + $0x3a0] sm:$0xf]  ;;  %1953 = vst [vmem:[%s2832_s1 + $0xd8] sm:$0x3] %v1553_v7  ;;  %v1595_v19 = vpack.c.bf16 %v2139_v40, %v1594_v16 }
  0xf7   :  { %1954 = vst [vmem:[%s2832_s1 + $0xda] sm:$0x3] %v1560_v8  ;;  %1955 = vst [vmem:[%s2832_s1 + $0xdc] sm:$0x3] %v1567_v9  ;;  %v1602_v20 = vpack.c.bf16 %v2139_v40, %v1601_v17  ;;  %v1609_v21 = vpack.c.bf16 %v2139_v40, %v1608_v18  ;;  %v1615_v22 = vld [vmem:[#allocation0 + $0x3a8] sm:$0xf] }
  0xf8   :  { %v1622_v23 = vld [vmem:[#allocation0 + $0x3b0] sm:$0xf]  ;;  %v1629_v24 = vld [vmem:[#allocation0 + $0x3b8] sm:$0xf]  ;;  %1956 = vst [vmem:[%s2832_s1 + $0xde] sm:$0x3] %v1574_v13  ;;  %v1616_v25 = vpack.c.bf16 %v2139_v40, %v1615_v22 }
  0xf9   :  { %1957 = vst [vmem:[%s2832_s1 + $0xe0] sm:$0x3] %v1581_v14  ;;  %1958 = vst [vmem:[%s2832_s1 + $0xe2] sm:$0x3] %v1588_v15  ;;  %v1623_v26 = vpack.c.bf16 %v2139_v40, %v1622_v23  ;;  %v1630_v27 = vpack.c.bf16 %v2139_v40, %v1629_v24  ;;  %v1636_v28 = vld [vmem:[#allocation0 + $0x3c0] sm:$0xf] }
  0xfa   :  { %v1643_v29 = vld [vmem:[#allocation0 + $0x3c8] sm:$0xf]  ;;  %v1650_v30 = vld [vmem:[#allocation0 + $0x3d0] sm:$0xf]  ;;  %1959 = vst [vmem:[%s2832_s1 + $0xe4] sm:$0x3] %v1595_v19  ;;  %v1637_v31 = vpack.c.bf16 %v2139_v40, %v1636_v28 }
  0xfb   :  { %1960 = vst [vmem:[%s2832_s1 + $0xe6] sm:$0x3] %v1602_v20  ;;  %1961 = vst [vmem:[%s2832_s1 + $0xe8] sm:$0x3] %v1609_v21  ;;  %v1644_v32 = vpack.c.bf16 %v2139_v40, %v1643_v29  ;;  %v1651_v33 = vpack.c.bf16 %v2139_v40, %v1650_v30  ;;  %v1657_v34 = vld [vmem:[#allocation0 + $0x3d8] sm:$0xf] }
  0xfc   :  { %v1664_v35 = vld [vmem:[#allocation0 + $0x3e0] sm:$0xf]  ;;  %v1671_v36 = vld [vmem:[#allocation0 + $0x3e8] sm:$0xf]  ;;  %1962 = vst [vmem:[%s2832_s1 + $0xea] sm:$0x3] %v1616_v25  ;;  %v1658_v37 = vpack.c.bf16 %v2139_v40, %v1657_v34 }
  0xfd   :  { %1963 = vst [vmem:[%s2832_s1 + $0xec] sm:$0x3] %v1623_v26  ;;  %1964 = vst [vmem:[%s2832_s1 + $0xee] sm:$0x3] %v1630_v27  ;;  %v1665_v38 = vpack.c.bf16 %v2139_v40, %v1664_v35  ;;  %v1672_v39 = vpack.c.bf16 %v2139_v40, %v1671_v36  ;;  %v1678_v41 = vld [vmem:[#allocation0 + $0x3f0] sm:$0xf] }
  0xfe   :  { %v1685_v42 = vld [vmem:[#allocation0 + $0x3f8] sm:$0xf]  ;;  %1965 = vst [vmem:[%s2832_s1 + $0xf0] sm:$0x3] %v1637_v31  ;;  %1966 = vst [vmem:[%s2832_s1 + $0xf2] sm:$0x3] %v1644_v32  ;;  %v1679_v43 = vpack.c.bf16 %v2139_v40, %v1678_v41 }
  0xff   :  { %1967 = vst [vmem:[%s2832_s1 + $0xf4] sm:$0x3] %v1651_v33  ;;  %v1686_v40 = vpack.c.bf16 %v2139_v40, %v1685_v42  ;;  %1968 = vst [vmem:[%s2832_s1 + $0xf6] sm:$0x3] %v1658_v37 }
 0x100   :  { %1969 = vst [vmem:[%s2832_s1 + $0xf8] sm:$0x3] %v1665_v38  ;;  %1970 = vst [vmem:[%s2832_s1 + $0xfa] sm:$0x3] %v1672_v39 }
 0x101   :  { %1971 = vst [vmem:[%s2832_s1 + $0xfc] sm:$0x3] %v1679_v43  ;;  %1972 = vst [vmem:[%s2832_s1 + $0xfe] sm:$0x3] %v1686_v40 }

// kernel: prtnet_forward.1
= control target key start
LH: loop header
LB: loop body
LE: loop exit
PB: predicated region body
PF: predicated region fallthrough
CT: control target
= control target key end

     0   :  { %s2073_s0 = inlined_call_operand.vmem [shape: bf16[2,2,16,8], index: 0, kind: input, shape index: {}]   ;;  %s2074_s1 = inlined_call_operand.vmem [shape: bf16[2,8,128], index: 1, kind: input, shape index: {}]   ;;  %s2075_s2 = inlined_call_operand.vmem [shape: f32[2,1,128], index: 2, kind: input, shape index: {}]   ;;  %s2076_s3 = inlined_call_operand.vmem [shape: bf16[2,128,128], index: 3, kind: input, shape index: {}]   ;;  %s2077_s4 = inlined_call_operand.vmem [shape: f32[2,1,128], index: 4, kind: input, shape index: {}]   ;;  %s2078_s5 = inlined_call_operand.vmem [shape: bf16[256,128], index: 5, kind: input, shape index: {}]   ;;  %s2079_s6 = inlined_call_operand.vmem [shape: f32[1,128], index: 6, kind: input, shape index: {}]   ;;  %s2080_s7 = inlined_call_operand.vmem [shape: bf16[128,2], index: 7, kind: input, shape index: {}]   ;;  %s2081_s8 = inlined_call_operand.vmem [shape: f32[1,2], index: 8, kind: input, shape index: {}]   ;;  %s2082_s9 = inlined_call_operand.hbm [shape: f32[2,1,128], index: 9, kind: output, shape index: {0}]   ;;  %s2083_s10 = inlined_call_operand.hbm [shape: f32[2,1,2], index: 10, kind: output, shape index: {1}]  }
   0x1   :  { %2085 = sst [smem:[#allocation10_spill]] %s2073_s0 }
   0x2   :  { %2086 = sst [smem:[#allocation11_spill]] %s2074_s1 }
   0x3   :  { %16 = vsyncpa [#allocation5], 0 }
   0x4   :  { %18 = vsyncpa [#allocation5 + $0x1], 0 }
   0x5   :  { %19 = vsyncpa [#allocation7], 0 }
   0x6   :  { %21 = vsyncpa [#allocation7 + $0x1], 0  ;;  %s1742_s13 = smov 0   ;;  %s1744_s14 = smov 0  }
   0x7   :  { %s1746_s15 = smov 0   ;;  %s1748_s16 = smov 0  }
   0x8   :  { %s1750_s17 = smov 0   ;;  %s1752_s18 = smov 0  }
   0x9 LB: > { %s1258_s19 = sadd.s32 4294967295, %s1681_s18   ;;  %s1259_s20 = sadd.s32 4294967294, %s1681_s18   ;;  %s1681_s18 = sphi %s1752_s18, %s27_s18   ;;  %s1677_s17 = sphi %s1750_s17, %s2096_s17   ;;  %s1673_s16 = sphi %s1748_s16, %s2095_s16   ;;  %s1669_s15 = sphi %s1746_s15, %s2094_s15   ;;  %s1665_s14 = sphi %s1744_s14, %s2093_s14   ;;  %s1661_s13 = sphi %s1742_s13, %s2092_s13  }
   0xa   : > { %s39_s21 = sadd.s32 1, %s1677_s17  ;;  %s48_s22 = sadd.s32 1, %s1669_s15 }
   0xb   : > { %p41_p0 = scmp.ge.s32.totalorder %s39_s21, 2  ;;  %p55_p1 = scmp.ne.s32.totalorder %s1669_s15, %s1665_s14 }
   0xc   : > { %p56_p2 = scmp.eq.s32.totalorder %s1681_s18, 0  ;;  %p253_p3 = scmp.eq.s32.totalorder %s1258_s19, 1 }
   0xd   : > { %s2098_s21 = smov (%p41_p0, %s39_s21), 0  ;;  %p258_p6 = scmp.ne.s32.totalorder %s1665_s14, %s1661_s13 }
   0xe   : > { %p57_p4 = por %p56_p2, %p55_p1  ;;  %p1781_p5 = por %p253_p3, %p55_p1 }
   0xf   : > { %s43_s24 = ssub.s32 %s1677_s17, %s2098_s21  ;;  %p259_p8 = scmp.eq.s32.totalorder %s1259_s20, 1 }
  0x10   : > { %p46_p7 = scmp.eq.s32.totalorder %s43_s24, 0  ;;  %p1261_p10 = scmp.ge.s32.totalorder %s1681_s18, 2 }
  0x11   : > { %p1792_p9 = por %p259_p8, %p258_p6 }
  0x12   : > { %s1790_s25 = scalar_select %p46_p7, %s1669_s15, %s48_s22  }
  0x13   : > { %325 = sbr.rel (%p1261_p10) target bundleno = 37 (0x25), region = 48 }
  0x1a   : > { %328 = sbr.rel (!%p57_p4) target bundleno = 37 (0x25), region = 52  ;;  %s330_s27 = sand.u32 (%p57_p4), 1, %s1669_s15  }
  0x1b   : > { %s1341_s28 = sshll.u32 (%p57_p4), %s1677_s17, 3  ;;  %s1262_s29 = sshll.u32 (%p57_p4), %s330_s27, 4 }
  0x1c   : > { %s2089_s0 = sld [smem:[#allocation10_spill]] (%p57_p4)  ;;  %s332_s19 = scalar_lea.vmem (%p57_p4), [#allocation3], %s1262_s29 }
  0x22   : > { %s337_s12 = scalar_lea.vmem %s2089_s0, %s1341_s28 }
  0x23   : > { %v353_v0 = vld [vmem:[%s337_s12] sm:$0xff]   ;;  %v357_v1 = vld [vmem:[%s337_s12 + $0x10] sm:$0xff]  }
  0x24   : > { %354 = vst [vmem:[%s332_s19] sm:$0xff] %v353_v0   ;;  %358 = vst [vmem:[%s332_s19 + $0x8] sm:$0xff] %v357_v1  }
  0x25 PF: > { %p1265_p11 = scmp.ge.s32.totalorder %s1681_s18, 1  ;;  %p390_p12 = scmp.lt.s32.totalorder %s1681_s18, 3 }
  0x27   : > { %p391_p13 = pnand %p1265_p11, %p390_p12 }
  0x28   : > { %s2090_s1 = sld [smem:[#allocation11_spill]] (!%p391_p13)  ;;  %vm466_vm0 = vcmask (!%p391_p13), 1043456   ;;  %v1683_v4 = vmov (!%p391_p13), 0.0   ;;  %s1816_s28 = sand.u32 (!%p391_p13), 1, %s1665_s14   ;;  %vm462_vm1 = vcmask (!%p391_p13), 64512   ;;  %v1531_v7 = vld [vmem:[%s2076_s3] sm:$0xff] (!%p391_p13)  }
  0x29   : > { %394 = sbr.rel (%p391_p13) target bundleno = 965 (0x3c5), region = 93  ;;  %1395 = vmatprep.subr.bf16.mxu0 (!%p391_p13), %v1683_v4  ;;  %443 = vst [vmem:[#allocation2] sm:$0x1] (!%p391_p13), %v1683_v4  ;;  %1401 = vmatprep.subr.bf16.mxu1 (!%p391_p13), %v1683_v4  ;;  %s1266_s29 = sshll.u32 (!%p391_p13), %s1816_s28, 4  ;;  %vm1684_vm2 = vmmov (!%p391_p13), 0   ;;  %v1532_v8 = vld [vmem:[%s2076_s3 + $0x40] sm:$0xff] (!%p391_p13)  }
  0x2a   : > { %1397 = vmatprep.mubr.msk.bf16.mxu0 (!%p391_p13), %vm1684_vm2, %v1683_v4  ;;  %1403 = vmatprep.mubr.msk.bf16.mxu1 (!%p391_p13), %vm1684_vm2, %v1683_v4  ;;  %s399_s20 = scalar_lea.vmem (!%p391_p13), [#allocation3], %s1266_s29  ;;  %v1533_v11 = vld [vmem:[%s2076_s3 + $0x8] sm:$0xff] (!%p391_p13)   ;;  %v1535_v13 = vld [vmem:[%s2076_s3 + $0x10] sm:$0xff] (!%p391_p13)   ;;  %v1537_v15 = vld [vmem:[%s2076_s3 + $0x18] sm:$0xff] (!%p391_p13)   ;;  %s430_s24 = scalar_lea.vmem (!%p391_p13), [#allocation4], %s1816_s28 }
  0x2b   : > { %v1529_v9 = vld [vmem:[%s399_s20] sm:$0xff] (!%p391_p13)   ;;  %v1530_v10 = vld [vmem:[%s399_s20 + $0x8] sm:$0xff] (!%p391_p13)   ;;  %s2084_s27 = sshll.u32 (!%p391_p13), %s1673_s16, 4  ;;  %s1145_s30 = sshll.u32 (!%p391_p13), %s430_s24, 4  ;;  %s1146_s30 = int_to_ptr.vmem [resolvable:$true] %s1145_s30 }
  0x2c   : > { %v1534_v12 = vld [vmem:[%s2076_s3 + $0x48] sm:$0xff] (!%p391_p13)   ;;  %v1536_v14 = vld [vmem:[%s2076_s3 + $0x50] sm:$0xff] (!%p391_p13)   ;;  %v1538_v16 = vld [vmem:[%s2076_s3 + $0x58] sm:$0xff] (!%p391_p13)   ;;  %s1995_s11 = scalar_lea.hbm (!%p391_p13), %s2082_s9, %s2084_s27  ;;  %s1129_s12 = scalar_lea.sflag (!%p391_p13), [#allocation5], %s1816_s28 }
  0x2d   : > { %v1539_v17 = vld [vmem:[%s2076_s3 + $0x20] sm:$0xff] (!%p391_p13)   ;;  %v1541_v19 = vld [vmem:[%s2076_s3 + $0x28] sm:$0xff] (!%p391_p13)   ;;  %v1543_v21 = vld [vmem:[%s2076_s3 + $0x30] sm:$0xff] (!%p391_p13)   ;;  %s1571_s19 = scalar_lea.vmem (!%p391_p13), %s1146_s30, 16  ;;  %s1685_s20 = smov (!%p391_p13), [#allocation4]  }
  0x2e   : > { %v449_v2 = vld [vmem:[%s2090_s1] sm:$0xf] (!%p391_p13)  ;;  %v1272_v3 = vld [vmem:[%s2090_s1 + $0x4] sm:$0xf] (!%p391_p13)  ;;  %v1542_v20 = vld [vmem:[%s2076_s3 + $0x68] sm:$0xff] (!%p391_p13)   ;;  %p1572_p0 = scmp.ne.s32.totalorder (!%p391_p13), %s1146_s30, %s1571_s19  ;;  %s1575_s22 = sshll.u32 (!%p391_p13), %s1685_s20, 4  ;;  %s1576_s22 = int_to_ptr.vmem [resolvable:$false] %s1575_s22 }
  0x2f   : > { %v468_v5 = vsel (!%p391_p13), %vm466_vm0, %v449_v2, 0  ;;  %v532_v6 = vsel (!%p391_p13), %vm466_vm0, %v1272_v3, 0  ;;  %v1540_v18 = vld [vmem:[%s2076_s3 + $0x60] sm:$0xff] (!%p391_p13)   ;;  %v1544_v22 = vld [vmem:[%s2076_s3 + $0x70] sm:$0xff] (!%p391_p13)   ;;  %v1545_v23 = vld [vmem:[%s2076_s3 + $0x38] sm:$0xff] (!%p391_p13)   ;;  %s1577_s1 = scalar_lea.vmem (!%p391_p13), %s1576_s22, 32  ;;  %p1578_p3 = scmp.lt.s32.totalorder (!%p391_p13), %s1146_s30, %s1576_s22 }
  0x30   : > { %1396 = vmatpush3.bf16.msra.mxu0 %v468_v5  ;;  %1402 = vmatpush3.bf16.msra.mxu1 %v532_v6  ;;  %v1546_v24 = vld [vmem:[%s2076_s3 + $0x78] sm:$0xff]   ;;  %v1547_v25 = vld [vmem:[%s2078_s5 + $0x40] sm:$0xff]   ;;  %v1549_v46 = vld [vmem:[%s2078_s5 + $0x48] sm:$0xff]   ;;  %p1573_p1 = pnand %p1572_p0, %p1781_p5  ;;  %p1579_p4 = scmp.lt.s32.totalorder %s1577_s1, %s1571_s19 }
  0x31   : > { %1407 = vmatprep.subr.bf16.mxu0 %v1683_v4  ;;  %1427 = vmatprep.subr.bf16.mxu1 %v1683_v4  ;;  %v1269_v26 = vld [vmem:[%s2075_s2] ss:$0 sm:$0xff]  ;;  %v1274_v27 = vld [vmem:[%s2075_s2 + $0x1] ss:$0 sm:$0xff]  ;;  %v1550_v48 = vld [vmem:[%s2078_s5 + $0x8] sm:$0xff]  }
  0x32   : > { %v1548_v44 = vld [vmem:[%s2078_s5] sm:$0xff]   ;;  %v1551_v49 = vld [vmem:[%s2078_s5 + $0x50] sm:$0xff]   ;;  %v1553_v51 = vld [vmem:[%s2078_s5 + $0x58] sm:$0xff]   ;;  %p1574_p2 = pneg %p1573_p1  ;;  %p1580_p6 = por %p1579_p4, %p1578_p3 }
  0x33   : > { %1398 = vmatmul.mubr.msk.bf16.vlgmr.msra.gmra.mrb[0].mxu0 %vm462_vm1, %v1529_v9  ;;  %1404 = vmatmul.mubr.msk.bf16.vlgmr.msra.gmra.mrb[0].mxu1 %vm462_vm1, %v1530_v10  ;;  %v1552_v50 = vld [vmem:[%s2078_s5 + $0x10] sm:$0xff]   ;;  %v1554_v52 = vld [vmem:[%s2078_s5 + $0x18] sm:$0xff]   ;;  %v1555_v53 = vld [vmem:[%s2078_s5 + $0x60] sm:$0xff]  }
  0x34   : > { %1408 = vmatpush3.bf16.msra.mxu0 %v1531_v7  ;;  %1428 = vmatpush3.bf16.msra.mxu1 %v1532_v8  ;;  %v1556_v54 = vld [vmem:[%s2078_s5 + $0x20] sm:$0xff]   ;;  %v1557_v55 = vld [vmem:[%s2078_s5 + $0x68] sm:$0xff]   ;;  %v1559_v57 = vld [vmem:[%s2078_s5 + $0x70] sm:$0xff]   ;;  %p1581_p7 = pnand %p1580_p6, %p1574_p2 }
  0x35   : > { %1409 = vmatprep.subr.bf16.mxu0 %v1683_v4  ;;  %1429 = vmatprep.subr.bf16.mxu1 %v1683_v4  ;;  %v1558_v56 = vld [vmem:[%s2078_s5 + $0x28] sm:$0xff]   ;;  %v1560_v58 = vld [vmem:[%s2078_s5 + $0x30] sm:$0xff]   ;;  %v1561_v59 = vld [vmem:[%s2078_s5 + $0x78] sm:$0xff]  }
  0x36   : > { %1423 = vmatprep.mubr.msk.bf16.mxu0 %vm1684_vm2, %v1683_v4  ;;  %1443 = vmatprep.mubr.msk.bf16.mxu1 %vm1684_vm2, %v1683_v4  ;;  %v1562_v60 = vld [vmem:[%s2078_s5 + $0x38] sm:$0xff]   ;;  %v1277_v61 = vld [vmem:[%s2077_s4] ss:$0 sm:$0xff]  ;;  %v1303_v62 = vld [vmem:[%s2077_s4 + $0x1] ss:$0 sm:$0xff] }
  0x38   : > { %1410 = vmatpush3.bf16.msra.mxu0 %v1533_v11  ;;  %1430 = vmatpush3.bf16.msra.mxu1 %v1534_v12 }
  0x39   : > { %1411 = vmatprep.subr.bf16.mxu0 %v1683_v4  ;;  %1431 = vmatprep.subr.bf16.mxu1 %v1683_v4 }
  0x3c   : > { %1412 = vmatpush3.bf16.msra.mxu0 %v1535_v13  ;;  %1432 = vmatpush3.bf16.msra.mxu1 %v1536_v14 }
  0x3d   : > { %1413 = vmatprep.subr.bf16.mxu0 %v1683_v4  ;;  %1433 = vmatprep.subr.bf16.mxu1 %v1683_v4 }
  0x40   : > { %1414 = vmatpush3.bf16.msra.mxu0 %v1537_v15  ;;  %1434 = vmatpush3.bf16.msra.mxu1 %v1538_v16 }
  0x41   : > { %1415 = vmatprep.subr.bf16.mxu0 %v1683_v4  ;;  %1435 = vmatprep.subr.bf16.mxu1 %v1683_v4 }
  0x44   : > { %1416 = vmatpush3.bf16.msra.mxu0 %v1539_v17  ;;  %1436 = vmatpush3.bf16.msra.mxu1 %v1540_v18  ;;  %v1563_v18 = vld [vmem:[%s2080_s7] sm:$0xff]  }
  0x45   : > { %1417 = vmatprep.subr.bf16.mxu0 %v1683_v4  ;;  %1437 = vmatprep.subr.bf16.mxu1 %v1683_v4 }
  0x48   : > { %1418 = vmatpush3.bf16.msra.mxu0 %v1541_v19  ;;  %1438 = vmatpush3.bf16.msra.mxu1 %v1542_v20  ;;  %v1564_v19 = vld [vmem:[%s2080_s7 + $0x8] sm:$0xff]   ;;  %v1565_v20 = vld [vmem:[%s2080_s7 + $0x10] sm:$0xff]  }
  0x49   : > { %1419 = vmatprep.subr.bf16.mxu0 %v1683_v4  ;;  %1439 = vmatprep.subr.bf16.mxu1 %v1683_v4 }
  0x4c   : > { %1420 = vmatpush3.bf16.msra.mxu0 %v1543_v21  ;;  %1440 = vmatpush3.bf16.msra.mxu1 %v1544_v22  ;;  %v1566_v21 = vld [vmem:[%s2080_s7 + $0x18] sm:$0xff]   ;;  %v1567_v22 = vld [vmem:[%s2080_s7 + $0x20] sm:$0xff]  }
  0x4d   : > { %1421 = vmatprep.subr.bf16.mxu0 %v1683_v4  ;;  %1441 = vmatprep.subr.bf16.mxu1 %v1683_v4 }
  0x50   : > { %1422 = vmatpush3.bf16.msra.mxu0 %v1545_v23  ;;  %1442 = vmatpush3.bf16.msra.mxu1 %v1546_v24  ;;  %v1568_v23 = vld [vmem:[%s2080_s7 + $0x28] sm:$0xff]   ;;  %v1569_v24 = vld [vmem:[%s2080_s7 + $0x30] sm:$0xff]  }
  0x51   : > { %1447 = vmatprep.subr.bf16.mxu1 %v1683_v4  ;;  %1364 = vmatprep.subr.bf16.mxu0 %v1547_v25  ;;  %v1570_v25 = vld [vmem:[%s2080_s7 + $0x38] sm:$0xff]  }
 0x106   : > { %v504_v28 = vpop.f32.mrb[0].mxu0  ;;  %v568_v30 = vpop.f32.mrb[0].mxu1 }
 0x107   : > { %v505_v29 = vadd.f32 %v1269_v26, %v504_v28  ;;  %v1399_v31 = vpop.f32.mrb[1].mxu0  ;;  %v569_v32 = vadd.f32 %v1274_v27, %v568_v30  ;;  %v1405_v33 = vpop.f32.mrb[1].mxu1 }
 0x108   : > { %v507_v34 = vpop.f32.mrb[2].mxu0  ;;  %v571_v37 = vpop.f32.mrb[2].mxu1 }
 0x109   : > { %v511_v35 = vmax.f32 %v505_v29, 0.0  ;;  %v508_v36 = vadd.f32 %v1269_v26, %v507_v34  ;;  %v1400_v38 = vpop.f32.mrb[3].mxu0  ;;  %v572_v39 = vadd.f32 %v1274_v27, %v571_v37  ;;  %v1406_v40 = vpop.f32.mrb[3].mxu1  ;;  %v575_v42 = vmax.f32 %v569_v32, 0.0  ;;  %v1312_v27 = vld [vmem:[%s2079_s6] ss:$0 sm:$0xff] }
 0x10a   : > { %v1004_v38 = vld [vmem:[#allocation2] sm:$0x1] }
 0x10b   : > { %v512_v41 = vmax.f32 %v508_v36, 0.0  ;;  %v576_v43 = vmax.f32 %v572_v39, 0.0 }
 0x10d   : > { %v577_v45 = vpack.c.bf16 %v512_v41, %v511_v35  ;;  %v692_v47 = vpack.c.bf16 %v576_v43, %v575_v42 }
 0x10f   : > { %1424 = vmatmul.mubr.bf16.vlgmr.msra.gmra.mrb[4].mxu0 %v577_v45  ;;  %1444 = vmatmul.mubr.bf16.vlgmr.msra.gmra.mrb[4].mxu1 %v692_v47 }
 0x110   : > { %1365 = vmatpush3.bf16.msra.mxu0 %v1548_v44  ;;  %1463 = vmatprep.mubr.msk.bf16.mxu1 %vm1684_vm2, %v1683_v4 }
 0x111   : > { %1366 = vmatprep.subr.bf16.mxu0 %v1549_v46  ;;  %1448 = vmatpush3.bf16.msra.mxu1 %v1563_v18 }
 0x112   : > { %1449 = vmatprep.subr.bf16.mxu1 %v1683_v4 }
 0x114   : > { %1367 = vmatpush3.bf16.msra.mxu0 %v1550_v48 }
 0x115   : > { %1368 = vmatprep.subr.bf16.mxu0 %v1551_v49  ;;  %1450 = vmatpush3.bf16.msra.mxu1 %v1564_v19 }
 0x116   : > { %1451 = vmatprep.subr.bf16.mxu1 %v1683_v4 }
 0x118   : > { %1369 = vmatpush3.bf16.msra.mxu0 %v1552_v50 }
 0x119   : > { %1370 = vmatprep.subr.bf16.mxu0 %v1553_v51  ;;  %1452 = vmatpush3.bf16.msra.mxu1 %v1565_v20 }
 0x11a   : > { %1453 = vmatprep.subr.bf16.mxu1 %v1683_v4 }
 0x11c   : > { %1371 = vmatpush3.bf16.msra.mxu0 %v1554_v52 }
 0x11d   : > { %1372 = vmatprep.subr.bf16.mxu0 %v1555_v53  ;;  %1454 = vmatpush3.bf16.msra.mxu1 %v1566_v21 }
 0x11e   : > { %1455 = vmatprep.subr.bf16.mxu1 %v1683_v4 }
 0x120   : > { %1373 = vmatpush3.bf16.msra.mxu0 %v1556_v54 }
 0x121   : > { %1374 = vmatprep.subr.bf16.mxu0 %v1557_v55  ;;  %1456 = vmatpush3.bf16.msra.mxu1 %v1567_v22 }
 0x122   : > { %1457 = vmatprep.subr.bf16.mxu1 %v1683_v4 }
 0x124   : > { %1375 = vmatpush3.bf16.msra.mxu0 %v1558_v56 }
 0x125   : > { %1376 = vmatprep.subr.bf16.mxu0 %v1559_v57  ;;  %1458 = vmatpush3.bf16.msra.mxu1 %v1568_v23 }
 0x126   : > { %1459 = vmatprep.subr.bf16.mxu1 %v1683_v4 }
 0x128   : > { %1377 = vmatpush3.bf16.msra.mxu0 %v1560_v58 }
 0x129   : > { %1378 = vmatprep.subr.bf16.mxu0 %v1561_v59  ;;  %1460 = vmatpush3.bf16.msra.mxu1 %v1569_v24 }
 0x12a   : > { %1461 = vmatprep.subr.bf16.mxu1 %v1683_v4 }
 0x12c   : > { %1379 = vmatpush3.bf16.msra.mxu0 %v1562_v60 }
 0x12d   : > { %1462 = vmatpush3.bf16.msra.mxu1 %v1570_v25 }
 0x1e2   : > { %v683_v63 = vpop.f32.mrb[4].mxu0  ;;  %v800_v1 = vpop.f32.mrb[4].mxu1 }
 0x1e3   : > { %v684_v0 = vadd.f32 %v1277_v61, %v683_v63  ;;  %v1425_v2 = vpop.f32.mrb[5].mxu0  ;;  %v801_v3 = vadd.f32 %v1303_v62, %v800_v1  ;;  %v1445_v5 = vpop.f32.mrb[5].mxu1 }
 0x1e4   : > { %v686_v6 = vpop.f32.mrb[6].mxu0  ;;  %v803_v8 = vpop.f32.mrb[6].mxu1 }
 0x1e5   : > { %v687_v7 = vadd.f32 %v1277_v61, %v686_v6  ;;  %v1426_v9 = vpop.f32.mrb[7].mxu0  ;;  %v804_v10 = vadd.f32 %v1303_v62, %v803_v8  ;;  %v1446_v11 = vpop.f32.mrb[7].mxu1  ;;  %v690_v12 = vmax.f32 %v684_v0, 0.0  ;;  %v807_v14 = vmax.f32 %v801_v3, 0.0 }
 0x1e7   : > { %v691_v13 = vmax.f32 %v687_v7, 0.0  ;;  %v808_v15 = vmax.f32 %v804_v10, 0.0 }
 0x1e9   : > { %v809_v16 = vpack.c.bf16 %v691_v13, %v690_v12  ;;  %v810_v17 = vpack.c.bf16 %v808_v15, %v807_v14 }
 0x1eb   : > { %978 = vmatprep.mubr.bf16.mxu0 %v810_v17 }
 0x1ec   : > { %979 = vmatmul.mubr.bf16.vlgmr.msra.gmra.mrb[8].mxu0 %v809_v16 }
 0x2bf   : > { %v1380_v26 = vpop.f32.mrb[8].mxu0 }
 0x2c0   : > { %v1381_v28 = vpop.f32.mrb[9].mxu0 }
 0x2c1   : > { %v1382_v29 = vadd.f32 %v1381_v28, %v1380_v26  ;;  %v1383_v30 = vpop.f32.mrb[10].mxu0 }
 0x2c2   : > { %v1384_v31 = vpop.f32.mrb[11].mxu0 }
 0x2c3   : > { %v981_v32 = vadd.f32 %v1382_v29, %v1312_v27 }
 0x2c5   : > { %v987_v33 = vmax.f32 %v981_v32, 0.0 }
 0x2c7   : > { %v1006_v34 = vrot.slane %v987_v33, 4 }
 0x2c9   : > { %v1007_v35 = vadd.f32 %v1006_v34, %v987_v33 }
 0x2cb   : > { %v1008_v36 = vrot.slane %v1007_v35, 2 }
 0x2cd   : > { %v1009_v37 = vadd.f32 %v1008_v36, %v1007_v35 }
 0x2cf   : > { %v1010_v4 = vrot.slane %v1009_v37, 1 }
 0x2d1   : > { %v1011_v39 = vadd.f32 %v1010_v4, %v1009_v37 }
 0x2d3   : > { %v1012_v40 = vadd.f32 %v1011_v39, %v1004_v38 }
 0x2d5   : > { %1013 = vst [vmem:[#allocation2] sm:$0x1] %v1012_v40 }
 0x2dc   : > { %v1017_v41 = vld [vmem:[#allocation2] sm:$0x1] }
 0x2dd   : > { %v1018_v42 = vmul.f32 0.125, %v1017_v41 }
 0x2df   : > { %v1020_v43 = vpack.c.bf16 %v1018_v42, %v1018_v42  ;;  %1019 = vst [vmem:[%s430_s24] sm:$0x1] %v1018_v42 }
 0x2e1   : > { %1464 = vmatmul.mubr.bf16.vlgmr.msra.gmra.mrb[8].mxu1 %v1020_v43 }
 0x2e2   : > { %1584 = shalt.err (!%p1581_p7)
}
 0x2e3   : > { %s1585_s24 = scalar_lea.hbm %s1995_s11, 16  ;;  %s1589_s20 = scalar_lea.hbm %s2082_s9, 32 }
 0x2e4   : > { %p1586_p8 = scmp.ne.s32.totalorder %s1995_s11, %s1585_s24  ;;  %p1590_p13 = scmp.lt.u32.totalorder %s1995_s11, %s2082_s9 }
 0x2e5   : > { %p1591_p0 = scmp.lt.u32.totalorder %s1589_s20, %s1585_s24  ;;  %p1593_p2 = scmp.lt.u32.totalorder %s1585_s24, %s1995_s11 }
 0x2e6   : > { %p1587_p11 = pnand %p1586_p8, %p1781_p5 }
 0x2e7   : > { %p1592_p1 = por %p1591_p0, %p1590_p13 }
 0x2e8   : > { %p1588_p12 = pneg %p1587_p11 }
 0x2e9   : > { %p1594_p3 = por %p1593_p2, %p1592_p1 }
 0x2eb   : > { %p1595_p4 = pnand %p1594_p3, %p1588_p12 }
 0x2ed   : > { %1598 = shalt.err (!%p1595_p4)
}
 0x2ee   : > { %1467 = dma.vmem_to_hbm [thread:$0]  (%p1781_p5), %s1146_s30, 16, %s1995_s11, %s1129_s12   ;;  %v1037_v44 = vld [vmem:[%s2081_s8] sm:$0x1]  ;;  %vm1126_vm3 = vcmask 8192  }
 0x2ef   : > { %s436_s27 = scalar_lea.vmem [#allocation6], %s1816_s28  ;;  %s2091_s24 = sshll.u32 %s1673_s16, 4 }
 0x2f0   : > { %s1158_s29 = sshll.u32 %s436_s27, 4  ;;  %s2024_s22 = scalar_lea.hbm %s2083_s10, %s2091_s24  ;;  %s2026_s29 = int_to_ptr.vmem [resolvable:$true] %s1158_s29 }
 0x2f1   : > { %s1133_s30 = scalar_lea.sflag [#allocation7], %s1816_s28  ;;  %s1599_s11 = scalar_lea.vmem %s2026_s29, 16 }
 0x2f2   : > { %p1600_p6 = scmp.ne.s32.totalorder %s2026_s29, %s1599_s11  ;;  %s1686_s16 = smov [#allocation6]  }
 0x2f3   : > { %s1603_s12 = sshll.u32 %s1686_s16, 4  ;;  %s1604_s12 = int_to_ptr.vmem [resolvable:$false] %s1603_s12 }
 0x2f4   : > { %p1601_p7 = pnand %p1600_p6, %p1781_p5  ;;  %s1605_s1 = scalar_lea.vmem %s1604_s12, 32 }
 0x2f5   : > { %p1606_p11 = scmp.lt.s32.totalorder %s2026_s29, %s1604_s12  ;;  %p1607_p12 = scmp.lt.s32.totalorder %s1605_s1, %s1599_s11 }
 0x2f6   : > { %p1602_p8 = pneg %p1601_p7 }
 0x2f7   : > { %p1608_p13 = por %p1607_p12, %p1606_p11 }
 0x2f9   : > { %p1609_p0 = pnand %p1608_p13, %p1602_p8 }
 0x3b4   : > { %v1120_v45 = vpop.f32.mrb[8].mxu1 }
 0x3b5   : > { %v1121_v46 = vadd.f32 %v1120_v45, %v1037_v44  ;;  %v1465_v47 = vpop.f32.mrb[9].mxu1 }
 0x3b6   : > { %v1123_v48 = vpop.f32.mrb[10].mxu1 }
 0x3b7   : > { %v1466_v49 = vpop.f32.mrb[11].mxu1  ;;  %1127 = vst.msk [vmem:[%s436_s27] sm:$0x1] %vm1126_vm3, %v1121_v46 }
 0x3b8   : > { %1612 = shalt.err (!%p1609_p0)
}
 0x3b9   : > { %s1613_s28 = scalar_lea.hbm %s2024_s22, 16  ;;  %s1617_s24 = scalar_lea.hbm %s2083_s10, 32 }
 0x3ba   : > { %p1614_p1 = scmp.ne.s32.totalorder %s2024_s22, %s1613_s28  ;;  %p1618_p4 = scmp.lt.u32.totalorder %s2024_s22, %s2083_s10 }
 0x3bb   : > { %p1619_p6 = scmp.lt.u32.totalorder %s1617_s24, %s1613_s28  ;;  %p1621_p8 = scmp.lt.u32.totalorder %s1613_s28, %s2024_s22 }
 0x3bc   : > { %p1615_p2 = pnand %p1614_p1, %p1781_p5 }
 0x3bd   : > { %p1620_p7 = por %p1619_p6, %p1618_p4 }
 0x3be   : > { %p1616_p3 = pneg %p1615_p2 }
 0x3bf   : > { %p1622_p11 = por %p1621_p8, %p1620_p7 }
 0x3c1   : > { %p1623_p12 = pnand %p1622_p11, %p1616_p3 }
 0x3c3   : > { %1626 = shalt.err (!%p1623_p12)
}
 0x3c4   : > { %1468 = dma.vmem_to_hbm [thread:$0]  (%p1781_p5), %s2026_s29, 16, %s2024_s22, %s1133_s30  }
 0x3c5 PF: > { %s1170_s11 = sand.u32 1, %s1661_s13   ;;  %p1472_p13 = pnand %p1261_p10, %p1792_p9 }
 0x3c6   : > { %s1171_s16 = scalar_lea.sflag [#allocation5], %s1170_s11 }
 0x3c7   : > { %1652 = dma.done.wait (!%p1472_p13), %s1171_s16, 16  }
 0x3c8   : > { %1654 = vsyncadd (!%p1472_p13), %s1171_s16, 4294967280  ;;  %s1179_s12 = scalar_lea.sflag [#allocation7], %s1170_s11 }
 0x3c9   : > { %1656 = dma.done.wait (!%p1472_p13), %s1179_s12, 16  }
 0x3ca   : > { %1658 = vsyncadd (!%p1472_p13), %s1179_s12, 4294967280  ;;  %s27_s18 = sadd.s32 1, %s1681_s18   ;;  %s2092_s13 = smov %s1665_s14 }
 0x3cb   : > { %p24_p0 = scmp.ge.s32.totalorder %s27_s18, 4   ;;  %s2093_s14 = smov %s1669_s15 }
 0x3cc   : > { %s2094_s15 = smov %s1790_s25  ;;  %s2095_s16 = smov %s1677_s17 }
 0x3cd   : > { %s2096_s17 = smov %s2098_s21  ;;  %26 = sbr.rel (!%p24_p0) target bundleno = 9 (0x9), region = 167 }
 0x3d4   :  { %1183 = vsyncpa [#allocation5], 1 }
 0x3d5   :  { %1185 = vsyncpa [#allocation5 + $0x1], 1 }
 0x3d6   :  { %1186 = vsyncpa [#allocation7], 1 }
 0x3d7   :  { %1188 = vsyncpa [#allocation7 + $0x1], 1 }

</bundles_post_ra>
